<compile_context>
chip_gen: v5e
topology: v5e:2x2
jax: 0.10.0
libtpu: 0.0.40
codegen_flags: <defaults>
</compile_context>

<pallas_src>
import math
import jax
import jax.numpy as jnp
from jax.experimental import pallas as pl
from jax.experimental.pallas import tpu as pltpu

N_HEADS = 8
EPS = 1e-5


def _layernorm(x, g, b):
    mu = jnp.mean(x, axis=-1, keepdims=True)
    d = x - mu
    var = jnp.mean(d * d, axis=-1, keepdims=True)
    return d * jax.lax.rsqrt(var + EPS) * g + b


# --------------------------- fused Pallas kernel -----------------------------

def fused_transformer_kernel(
        x_ref, wproj_ref, pos_ref, seg_ref, segt_ref,
        wqkv_ref, bqkv_ref, wo_ref, bo_ref, ln1g_ref, ln1b_ref,
        w1_ref, b1_ref, w2_ref, b2_ref, ln2g_ref, ln2b_ref,
        lng_ref, lnb_ref, wdec_ref, bdec_ref,
        o_ref):
    B, S, K = x_ref.shape
    H = seg_ref.shape[1]
    hd = K // H
    L = wqkv_ref.shape[0]
    BS = B * S
    scale = 1.0 / math.sqrt(hd)

    seg = seg_ref[...]          # (K, H)  lane -> head one-hot (segmented reduce)
    segt = segt_ref[...]        # (H, K)  head -> lane expansion

    # ---- input projection + positional embedding: one matmul over all rows ----
    xf = x_ref[...].reshape(BS, K)
    h = jnp.dot(xf, wproj_ref[...], preferred_element_type=jnp.float32)
    h = (h.reshape(B, S, K) + pos_ref[...]).reshape(BS, K)      # (BS, K)

    # ---- encoder layers (weights stacked along leading L axis, VMEM-resident) ----
    for l in range(L):
        wqkv, bqkv = wqkv_ref[l], bqkv_ref[l]                   # (K,3K), (1,3K)
        wo, bo = wo_ref[l], bo_ref[l]
        ln1g, ln1b = ln1g_ref[l], ln1b_ref[l]
        w1, b1 = w1_ref[l], b1_ref[l]
        w2, b2 = w2_ref[l], b2_ref[l]
        ln2g, ln2b = ln2g_ref[l], ln2b_ref[l]

        # fused QKV projection: single (BS, K) @ (K, 3K) matmul
        qkv = jnp.dot(h, wqkv, preferred_element_type=jnp.float32) + bqkv
        q = (qkv[:, :K] * scale).reshape(B, S, K)
        k = qkv[:, K:2 * K].reshape(B, S, K)
        v = qkv[:, 2 * K:].reshape(B, S, K)

        # self-attention over the B axis (PyTorch seq axis), batched over all keys
        attn_rows = []
        for b in range(B):
            qk = q[b][None, :, :] * k                           # (B, S, K)
            sc = jnp.dot(qk.reshape(BS, K), seg,
                         preferred_element_type=jnp.float32).reshape(B, S, H)
            m = jnp.max(sc, axis=0, keepdims=True)
            e = jnp.exp(sc - m)
            p = e / jnp.sum(e, axis=0, keepdims=True)           # softmax over keys
            p_lane = jnp.dot(p.reshape(BS, H), segt,
                             preferred_element_type=jnp.float32).reshape(B, S, K)
            attn_rows.append(jnp.sum(p_lane * v, axis=0))       # (S, K)
        attn = jnp.concatenate(attn_rows, axis=0)               # (BS, K)
        attn = jnp.dot(attn, wo, preferred_element_type=jnp.float32) + bo

        h = _layernorm(h + attn, ln1g, ln1b)
        ff = jnp.maximum(
            jnp.dot(h, w1, preferred_element_type=jnp.float32) + b1, 0.0)
        ff = jnp.dot(ff, w2, preferred_element_type=jnp.float32) + b2
        h = _layernorm(h + ff, ln2g, ln2b)

    # ---- head: mean over the 16 positions -> LayerNorm -> decoder ----
    hm = jnp.mean(h.reshape(B, S, K), axis=1)                   # (B, K)
    y = _layernorm(hm, lng_ref[...], lnb_ref[...])
    o_ref[...] = (jnp.dot(y, wdec_ref[...], preferred_element_type=jnp.float32)
                  + bdec_ref[...])


# --------------------------- wrappers ----------------------------------------

def _zero_map(ndim):
    return lambda i: (0,) * ndim


def prepare_params(params):
    """One-time weight preparation (transposes / stacking) outside the hot path."""
    K = params["w_proj"].shape[0]
    H = N_HEADS
    hd = K // H
    lane_head = jnp.arange(K) // hd
    seg = (lane_head[:, None] == jnp.arange(H)[None, :]).astype(jnp.float32)  # (K,H)
    layers = params["layers"]
    stk = lambda fn: jnp.stack([fn(lp) for lp in layers])
    return dict(
        w_proj=params["w_proj"].T,                              # (K, K)
        pos=params["pos"][0],                                   # (S, K)
        seg=seg, segt=seg.T,
        w_qkv=stk(lambda lp: lp["w_in"].T),                     # (L, K, 3K)
        b_qkv=stk(lambda lp: lp["b_in"].reshape(1, 3 * K)),     # (L, 1, 3K)
        w_out=stk(lambda lp: lp["w_out"].T),                    # (L, K, K)
        b_out=stk(lambda lp: lp["b_out"].reshape(1, K)),
        ln1_g=stk(lambda lp: lp["ln1_g"].reshape(1, K)),
        ln1_b=stk(lambda lp: lp["ln1_b"].reshape(1, K)),
        w1=stk(lambda lp: lp["w1"].T),                          # (L, K, 2K)
        b1=stk(lambda lp: lp["b1"].reshape(1, 2 * K)),
        w2=stk(lambda lp: lp["w2"].T),                          # (L, 2K, K)
        b2=stk(lambda lp: lp["b2"].reshape(1, K)),
        ln2_g=stk(lambda lp: lp["ln2_g"].reshape(1, K)),
        ln2_b=stk(lambda lp: lp["ln2_b"].reshape(1, K)),
        ln_g=params["ln_g"].reshape(1, K),
        ln_b=params["ln_b"].reshape(1, K),
        w_dec=params["w_dec"].T,                                # (K, NC)
        b_dec=params["b_dec"].reshape(1, -1),                   # (1, NC)
    )


def transformer_forward(x, prep):
    B, S, K = x.shape
    NC = prep["w_dec"].shape[1]
    args = (x, prep["w_proj"], prep["pos"], prep["seg"], prep["segt"],
            prep["w_qkv"], prep["b_qkv"], prep["w_out"], prep["b_out"],
            prep["ln1_g"], prep["ln1_b"], prep["w1"], prep["b1"],
            prep["w2"], prep["b2"], prep["ln2_g"], prep["ln2_b"],
            prep["ln_g"], prep["ln_b"], prep["w_dec"], prep["b_dec"])
    # Entire forward in a single pallas_call; all weights (<1 MiB) in VMEM.
    # TODO(synk): everything runs on one TensorCore; attention mixes tokens
    # across the batch axis, so only the 16-position axis could be grid-sharded
    # for v7x's second core — not worth it at these tiny shapes.
    return pl.pallas_call(
        fused_transformer_kernel,
        grid=(1,),
        in_specs=[pl.BlockSpec(a.shape, _zero_map(a.ndim)) for a in args],
        out_specs=pl.BlockSpec((B, NC), _zero_map(2)),
        out_shape=jax.ShapeDtypeStruct((B, NC), jnp.float32),
        compiler_params=pltpu.CompilerParams(dimension_semantics=("arbitrary",)),
    )(*args)


# --------------------------- pure-JAX reference ------------------------------

def _ref_layernorm(x, g, b):
    mu = x.mean(-1, keepdims=True)
    var = ((x - mu) ** 2).mean(-1, keepdims=True)
    return (x - mu) / jnp.sqrt(var + EPS) * g + b


def reference_forward(x, params):
    B, S, K = x.shape
    H = N_HEADS
    hd = K // H
    x = x @ params["w_proj"].T + params["pos"]
    for lp in params["layers"]:
        qkv = x @ lp["w_in"].T + lp["b_in"]
        q, k, v = qkv[..., :K], qkv[..., K:2 * K], qkv[..., 2 * K:]
        q = q.reshape(B, S, H, hd)
        k = k.reshape(B, S, H, hd)
        v = v.reshape(B, S, H, hd)
        sc = jnp.einsum("snhd,tnhd->nhst", q, k) / math.sqrt(hd)
        p = jax.nn.softmax(sc, axis=-1)
        o = jnp.einsum("nhst,tnhd->snhd", p, v).reshape(B, S, K)
        o = o @ lp["w_out"].T + lp["b_out"]
        x = _ref_layernorm(x + o, lp["ln1_g"], lp["ln1_b"])
        ff = jax.nn.relu(x @ lp["w1"].T + lp["b1"]) @ lp["w2"].T + lp["b2"]
        x = _ref_layernorm(x + ff, lp["ln2_g"], lp["ln2_b"])
    x = x.mean(axis=1)
    x = _ref_layernorm(x, params["ln_g"], params["ln_b"])
    return x @ params["w_dec"].T + params["b_dec"]


# --------------------------- deterministic params ----------------------------

def init_params(k, n_classes, n_layers=2, seed=0):
    root = jax.random.PRNGKey(seed)
    cnt = [0]

    def rnd(shape, scale=0.1):
        cnt[0] += 1
        return scale * jax.random.normal(jax.random.fold_in(root, cnt[0]),
                                         shape, jnp.float32)

    params = dict(
        w_proj=rnd((k, k)),                 # linear_proj.weight (no bias)
        pos=rnd((1, 16, k), 1.0),           # pos_embedding ~ randn
        w_dec=rnd((n_classes, k)),
        b_dec=rnd((n_classes,), 0.02),
        ln_g=jnp.ones((k,), jnp.float32),
        ln_b=jnp.zeros((k,), jnp.float32),
        layers=[],
    )
    for _ in range(n_layers):
        params["layers"].append(dict(
            w_in=rnd((3 * k, k)), b_in=rnd((3 * k,), 0.02),
            w_out=rnd((k, k)), b_out=rnd((k,), 0.02),
            ln1_g=jnp.ones((k,), jnp.float32), ln1_b=jnp.zeros((k,), jnp.float32),
            w1=rnd((2 * k, k)), b1=rnd((2 * k,), 0.02),
            w2=rnd((k, 2 * k)), b2=rnd((k,), 0.02),
            ln2_g=jnp.ones((k,), jnp.float32), ln2_b=jnp.zeros((k,), jnp.float32),
        ))
    return params


if __name__ == "__main__":
    B, S, K, NC = 2, 16, 32, 10          # k=32 (divisible by 8 heads), seq fixed at 16
    params = init_params(K, NC)
    prep = prepare_params(params)        # transposes/stacking done once, not per call
    x = jax.random.normal(jax.random.PRNGKey(0), (B, S, K), jnp.float32)

    out = jax.block_until_ready(transformer_forward(x, prep))

    ref = reference_forward(x, params)
    err = float(jnp.max(jnp.abs(out - ref)))
    assert out.shape == (B, NC), out.shape
    assert err < 5e-2, f"max abs err {err}"
    print("KERNEL_OK")
</pallas_src>

<mosaic_0001>
module attributes {stable_mosaic.version = 11 : i64} {
  func.func @fused_transformer_kernel(%arg0: i32, %arg1: memref<2x16x32xf32, #tpu.memory_space<vmem>>, %arg2: memref<32x32xf32, #tpu.memory_space<vmem>>, %arg3: memref<16x32xf32, #tpu.memory_space<vmem>>, %arg4: memref<32x8xf32, #tpu.memory_space<vmem>>, %arg5: memref<8x32xf32, #tpu.memory_space<vmem>>, %arg6: memref<2x32x96xf32, #tpu.memory_space<vmem>>, %arg7: memref<2x1x96xf32, #tpu.memory_space<vmem>>, %arg8: memref<2x32x32xf32, #tpu.memory_space<vmem>>, %arg9: memref<2x1x32xf32, #tpu.memory_space<vmem>>, %arg10: memref<2x1x32xf32, #tpu.memory_space<vmem>>, %arg11: memref<2x1x32xf32, #tpu.memory_space<vmem>>, %arg12: memref<2x32x64xf32, #tpu.memory_space<vmem>>, %arg13: memref<2x1x64xf32, #tpu.memory_space<vmem>>, %arg14: memref<2x64x32xf32, #tpu.memory_space<vmem>>, %arg15: memref<2x1x32xf32, #tpu.memory_space<vmem>>, %arg16: memref<2x1x32xf32, #tpu.memory_space<vmem>>, %arg17: memref<2x1x32xf32, #tpu.memory_space<vmem>>, %arg18: memref<1x32xf32, #tpu.memory_space<vmem>>, %arg19: memref<1x32xf32, #tpu.memory_space<vmem>>, %arg20: memref<32x10xf32, #tpu.memory_space<vmem>>, %arg21: memref<1x10xf32, #tpu.memory_space<vmem>>, %arg22: memref<2x10xf32, #tpu.memory_space<vmem>>) attributes {dimension_semantics = [#tpu.dimension_semantics<arbitrary>], iteration_bounds = array<i64: 1>, scalar_prefetch = 0 : i64, scratch_operands = 0 : i64, tpu.core_type = #tpu.core_type<tc>, window_params = [{pipeline_mode = #tpu.pipeline_mode<synchronous>, transform_indices = @transform_0, window_bounds = array<i64: 2, 16, 32>}, {pipeline_mode = #tpu.pipeline_mode<synchronous>, transform_indices = @transform_1, window_bounds = array<i64: 32, 32>}, {pipeline_mode = #tpu.pipeline_mode<synchronous>, transform_indices = @transform_2, window_bounds = array<i64: 16, 32>}, {pipeline_mode = #tpu.pipeline_mode<synchronous>, transform_indices = @transform_3, window_bounds = array<i64: 32, 8>}, {pipeline_mode = #tpu.pipeline_mode<synchronous>, transform_indices = @transform_4, window_bounds = array<i64: 8, 32>}, {pipeline_mode = #tpu.pipeline_mode<synchronous>, transform_indices = @transform_5, window_bounds = array<i64: 2, 32, 96>}, {pipeline_mode = #tpu.pipeline_mode<synchronous>, transform_indices = @transform_6, window_bounds = array<i64: 2, 1, 96>}, {pipeline_mode = #tpu.pipeline_mode<synchronous>, transform_indices = @transform_7, window_bounds = array<i64: 2, 32, 32>}, {pipeline_mode = #tpu.pipeline_mode<synchronous>, transform_indices = @transform_8, window_bounds = array<i64: 2, 1, 32>}, {pipeline_mode = #tpu.pipeline_mode<synchronous>, transform_indices = @transform_9, window_bounds = array<i64: 2, 1, 32>}, {pipeline_mode = #tpu.pipeline_mode<synchronous>, transform_indices = @transform_10, window_bounds = array<i64: 2, 1, 32>}, {pipeline_mode = #tpu.pipeline_mode<synchronous>, transform_indices = @transform_11, window_bounds = array<i64: 2, 32, 64>}, {pipeline_mode = #tpu.pipeline_mode<synchronous>, transform_indices = @transform_12, window_bounds = array<i64: 2, 1, 64>}, {pipeline_mode = #tpu.pipeline_mode<synchronous>, transform_indices = @transform_13, window_bounds = array<i64: 2, 64, 32>}, {pipeline_mode = #tpu.pipeline_mode<synchronous>, transform_indices = @transform_14, window_bounds = array<i64: 2, 1, 32>}, {pipeline_mode = #tpu.pipeline_mode<synchronous>, transform_indices = @transform_15, window_bounds = array<i64: 2, 1, 32>}, {pipeline_mode = #tpu.pipeline_mode<synchronous>, transform_indices = @transform_16, window_bounds = array<i64: 2, 1, 32>}, {pipeline_mode = #tpu.pipeline_mode<synchronous>, transform_indices = @transform_17, window_bounds = array<i64: 1, 32>}, {pipeline_mode = #tpu.pipeline_mode<synchronous>, transform_indices = @transform_18, window_bounds = array<i64: 1, 32>}, {pipeline_mode = #tpu.pipeline_mode<synchronous>, transform_indices = @transform_19, window_bounds = array<i64: 32, 10>}, {pipeline_mode = #tpu.pipeline_mode<synchronous>, transform_indices = @transform_20, window_bounds = array<i64: 1, 10>}, {pipeline_mode = #tpu.pipeline_mode<synchronous>, transform_indices = @transform_21, window_bounds = array<i64: 2, 10>}]} {
    %c0 = arith.constant 0 : index
    %c0_0 = arith.constant 0 : index
    %0 = vector.load %arg4[%c0, %c0_0] : memref<32x8xf32, #tpu.memory_space<vmem>>, vector<32x8xf32>
    %c0_1 = arith.constant 0 : index
    %c0_2 = arith.constant 0 : index
    %1 = vector.load %arg5[%c0_1, %c0_2] : memref<8x32xf32, #tpu.memory_space<vmem>>, vector<8x32xf32>
    %c0_3 = arith.constant 0 : index
    %c0_4 = arith.constant 0 : index
    %c0_5 = arith.constant 0 : index
    %2 = vector.load %arg1[%c0_3, %c0_4, %c0_5] : memref<2x16x32xf32, #tpu.memory_space<vmem>>, vector<2x16x32xf32>
    %3 = vector.shape_cast %2 : vector<2x16x32xf32> to vector<32x32xf32>
    %c0_6 = arith.constant 0 : index
    %c0_7 = arith.constant 0 : index
    %4 = vector.load %arg2[%c0_6, %c0_7] : memref<32x32xf32, #tpu.memory_space<vmem>>, vector<32x32xf32>
    %cst = arith.constant dense<0.000000e+00> : vector<32x32xf32>
    %5 = tpu.matmul %3, %4, %cst {dimension_numbers = #tpu.dot_dimension_numbers<[1], [0], [0], [1], [0, 0, 1, 1], [], []>} : vector<32x32xf32>, vector<32x32xf32>, vector<32x32xf32> -> vector<32x32xf32>
    %6 = vector.shape_cast %5 : vector<32x32xf32> to vector<2x16x32xf32>
    %c0_8 = arith.constant 0 : index
    %c0_9 = arith.constant 0 : index
    %7 = vector.load %arg3[%c0_8, %c0_9] : memref<16x32xf32, #tpu.memory_space<vmem>>, vector<16x32xf32>
    %8 = vector.shape_cast %7 : vector<16x32xf32> to vector<1x16x32xf32>
    %9 = vector.broadcast %8 : vector<1x16x32xf32> to vector<2x16x32xf32>
    %10 = arith.addf %6, %9 : vector<2x16x32xf32>
    %11 = vector.shape_cast %10 : vector<2x16x32xf32> to vector<32x32xf32>
    %c0_10 = arith.constant 0 : index
    %c0_11 = arith.constant 0 : index
    %c0_12 = arith.constant 0 : index
    %12 = vector.load %arg6[%c0_10, %c0_11, %c0_12] : memref<2x32x96xf32, #tpu.memory_space<vmem>>, vector<1x32x96xf32>
    %13 = vector.shape_cast %12 : vector<1x32x96xf32> to vector<32x96xf32>
    %c0_13 = arith.constant 0 : index
    %c0_14 = arith.constant 0 : index
    %c0_15 = arith.constant 0 : index
    %14 = vector.load %arg7[%c0_13, %c0_14, %c0_15] : memref<2x1x96xf32, #tpu.memory_space<vmem>>, vector<1x1x96xf32>
    %15 = vector.shape_cast %14 : vector<1x1x96xf32> to vector<1x96xf32>
    %c0_16 = arith.constant 0 : index
    %c0_17 = arith.constant 0 : index
    %c0_18 = arith.constant 0 : index
    %16 = vector.load %arg8[%c0_16, %c0_17, %c0_18] : memref<2x32x32xf32, #tpu.memory_space<vmem>>, vector<1x32x32xf32>
    %17 = vector.shape_cast %16 : vector<1x32x32xf32> to vector<32x32xf32>
    %c0_19 = arith.constant 0 : index
    %c0_20 = arith.constant 0 : index
    %c0_21 = arith.constant 0 : index
    %18 = vector.load %arg9[%c0_19, %c0_20, %c0_21] : memref<2x1x32xf32, #tpu.memory_space<vmem>>, vector<1x1x32xf32>
    %19 = vector.shape_cast %18 : vector<1x1x32xf32> to vector<1x32xf32>
    %c0_22 = arith.constant 0 : index
    %c0_23 = arith.constant 0 : index
    %c0_24 = arith.constant 0 : index
    %20 = vector.load %arg10[%c0_22, %c0_23, %c0_24] : memref<2x1x32xf32, #tpu.memory_space<vmem>>, vector<1x1x32xf32>
    %21 = vector.shape_cast %20 : vector<1x1x32xf32> to vector<1x32xf32>
    %c0_25 = arith.constant 0 : index
    %c0_26 = arith.constant 0 : index
    %c0_27 = arith.constant 0 : index
    %22 = vector.load %arg11[%c0_25, %c0_26, %c0_27] : memref<2x1x32xf32, #tpu.memory_space<vmem>>, vector<1x1x32xf32>
    %23 = vector.shape_cast %22 : vector<1x1x32xf32> to vector<1x32xf32>
    %c0_28 = arith.constant 0 : index
    %c0_29 = arith.constant 0 : index
    %c0_30 = arith.constant 0 : index
    %24 = vector.load %arg12[%c0_28, %c0_29, %c0_30] : memref<2x32x64xf32, #tpu.memory_space<vmem>>, vector<1x32x64xf32>
    %25 = vector.shape_cast %24 : vector<1x32x64xf32> to vector<32x64xf32>
    %c0_31 = arith.constant 0 : index
    %c0_32 = arith.constant 0 : index
    %c0_33 = arith.constant 0 : index
    %26 = vector.load %arg13[%c0_31, %c0_32, %c0_33] : memref<2x1x64xf32, #tpu.memory_space<vmem>>, vector<1x1x64xf32>
    %27 = vector.shape_cast %26 : vector<1x1x64xf32> to vector<1x64xf32>
    %c0_34 = arith.constant 0 : index
    %c0_35 = arith.constant 0 : index
    %c0_36 = arith.constant 0 : index
    %28 = vector.load %arg14[%c0_34, %c0_35, %c0_36] : memref<2x64x32xf32, #tpu.memory_space<vmem>>, vector<1x64x32xf32>
    %29 = vector.shape_cast %28 : vector<1x64x32xf32> to vector<64x32xf32>
    %c0_37 = arith.constant 0 : index
    %c0_38 = arith.constant 0 : index
    %c0_39 = arith.constant 0 : index
    %30 = vector.load %arg15[%c0_37, %c0_38, %c0_39] : memref<2x1x32xf32, #tpu.memory_space<vmem>>, vector<1x1x32xf32>
    %31 = vector.shape_cast %30 : vector<1x1x32xf32> to vector<1x32xf32>
    %c0_40 = arith.constant 0 : index
    %c0_41 = arith.constant 0 : index
    %c0_42 = arith.constant 0 : index
    %32 = vector.load %arg16[%c0_40, %c0_41, %c0_42] : memref<2x1x32xf32, #tpu.memory_space<vmem>>, vector<1x1x32xf32>
    %33 = vector.shape_cast %32 : vector<1x1x32xf32> to vector<1x32xf32>
    %c0_43 = arith.constant 0 : index
    %c0_44 = arith.constant 0 : index
    %c0_45 = arith.constant 0 : index
    %34 = vector.load %arg17[%c0_43, %c0_44, %c0_45] : memref<2x1x32xf32, #tpu.memory_space<vmem>>, vector<1x1x32xf32>
    %35 = vector.shape_cast %34 : vector<1x1x32xf32> to vector<1x32xf32>
    %cst_46 = arith.constant dense<0.000000e+00> : vector<32x96xf32>
    %36 = tpu.matmul %11, %13, %cst_46 {dimension_numbers = #tpu.dot_dimension_numbers<[1], [0], [0], [1], [0, 0, 1, 1], [], []>} : vector<32x32xf32>, vector<32x96xf32>, vector<32x96xf32> -> vector<32x96xf32>
    %37 = vector.broadcast %15 : vector<1x96xf32> to vector<32x96xf32>
    %38 = arith.addf %36, %37 : vector<32x96xf32>
    %39 = vector.extract_strided_slice %38 {offsets = [0, 0], sizes = [32, 32], strides = [1, 1]} : vector<32x96xf32> to vector<32x32xf32>
    %cst_47 = arith.constant 5.000000e-01 : f32
    %40 = vector.broadcast %cst_47 : f32 to vector<32x32xf32>
    %41 = arith.mulf %39, %40 : vector<32x32xf32>
    %42 = vector.shape_cast %41 : vector<32x32xf32> to vector<2x16x32xf32>
    %43 = vector.extract_strided_slice %38 {offsets = [0, 32], sizes = [32, 32], strides = [1, 1]} : vector<32x96xf32> to vector<32x32xf32>
    %44 = vector.shape_cast %43 : vector<32x32xf32> to vector<2x16x32xf32>
    %45 = vector.extract_strided_slice %38 {offsets = [0, 64], sizes = [32, 32], strides = [1, 1]} : vector<32x96xf32> to vector<32x32xf32>
    %46 = vector.shape_cast %45 : vector<32x32xf32> to vector<2x16x32xf32>
    %47 = vector.extract_strided_slice %42 {offsets = [0, 0, 0], sizes = [1, 16, 32], strides = [1, 1, 1]} : vector<2x16x32xf32> to vector<1x16x32xf32>
    %48 = vector.shape_cast %47 : vector<1x16x32xf32> to vector<16x32xf32>
    %49 = vector.shape_cast %48 : vector<16x32xf32> to vector<1x16x32xf32>
    %50 = vector.broadcast %49 : vector<1x16x32xf32> to vector<2x16x32xf32>
    %51 = arith.mulf %50, %44 : vector<2x16x32xf32>
    %52 = vector.shape_cast %51 : vector<2x16x32xf32> to vector<32x32xf32>
    %cst_48 = arith.constant dense<0.000000e+00> : vector<32x8xf32>
    %53 = tpu.matmul %52, %0, %cst_48 {dimension_numbers = #tpu.dot_dimension_numbers<[1], [0], [0], [1], [0, 0, 1, 1], [], []>} : vector<32x32xf32>, vector<32x8xf32>, vector<32x8xf32> -> vector<32x8xf32>
    %54 = vector.shape_cast %53 : vector<32x8xf32> to vector<2x16x8xf32>
    %cst_49 = arith.constant dense<0xFF800000> : vector<16x8xf32>
    %55 = vector.multi_reduction <maximumf>, %54, %cst_49 [0] : vector<2x16x8xf32> to vector<16x8xf32>
    %56 = vector.shape_cast %55 : vector<16x8xf32> to vector<1x16x8xf32>
    %57 = vector.broadcast %56 : vector<1x16x8xf32> to vector<2x16x8xf32>
    %58 = arith.subf %54, %57 : vector<2x16x8xf32>
    %59 = math.exp %58 : vector<2x16x8xf32>
    %cst_50 = arith.constant dense<0.000000e+00> : vector<16x8xf32>
    %60 = vector.multi_reduction <add>, %59, %cst_50 [0] : vector<2x16x8xf32> to vector<16x8xf32>
    %61 = vector.shape_cast %60 : vector<16x8xf32> to vector<1x16x8xf32>
    %62 = vector.broadcast %61 : vector<1x16x8xf32> to vector<2x16x8xf32>
    %63 = arith.divf %59, %62 : vector<2x16x8xf32>
    %64 = vector.shape_cast %63 : vector<2x16x8xf32> to vector<32x8xf32>
    %cst_51 = arith.constant dense<0.000000e+00> : vector<32x32xf32>
    %65 = tpu.matmul %64, %1, %cst_51 {dimension_numbers = #tpu.dot_dimension_numbers<[1], [0], [0], [1], [0, 0, 1, 1], [], []>} : vector<32x8xf32>, vector<8x32xf32>, vector<32x32xf32> -> vector<32x32xf32>
    %66 = vector.shape_cast %65 : vector<32x32xf32> to vector<2x16x32xf32>
    %67 = arith.mulf %66, %46 : vector<2x16x32xf32>
    %cst_52 = arith.constant dense<0.000000e+00> : vector<16x32xf32>
    %68 = vector.multi_reduction <add>, %67, %cst_52 [0] : vector<2x16x32xf32> to vector<16x32xf32>
    %69 = vector.extract_strided_slice %42 {offsets = [1, 0, 0], sizes = [1, 16, 32], strides = [1, 1, 1]} : vector<2x16x32xf32> to vector<1x16x32xf32>
    %70 = vector.shape_cast %69 : vector<1x16x32xf32> to vector<16x32xf32>
    %71 = vector.shape_cast %70 : vector<16x32xf32> to vector<1x16x32xf32>
    %72 = vector.broadcast %71 : vector<1x16x32xf32> to vector<2x16x32xf32>
    %73 = arith.mulf %72, %44 : vector<2x16x32xf32>
    %74 = vector.shape_cast %73 : vector<2x16x32xf32> to vector<32x32xf32>
    %cst_53 = arith.constant dense<0.000000e+00> : vector<32x8xf32>
    %75 = tpu.matmul %74, %0, %cst_53 {dimension_numbers = #tpu.dot_dimension_numbers<[1], [0], [0], [1], [0, 0, 1, 1], [], []>} : vector<32x32xf32>, vector<32x8xf32>, vector<32x8xf32> -> vector<32x8xf32>
    %76 = vector.shape_cast %75 : vector<32x8xf32> to vector<2x16x8xf32>
    %cst_54 = arith.constant dense<0xFF800000> : vector<16x8xf32>
    %77 = vector.multi_reduction <maximumf>, %76, %cst_54 [0] : vector<2x16x8xf32> to vector<16x8xf32>
    %78 = vector.shape_cast %77 : vector<16x8xf32> to vector<1x16x8xf32>
    %79 = vector.broadcast %78 : vector<1x16x8xf32> to vector<2x16x8xf32>
    %80 = arith.subf %76, %79 : vector<2x16x8xf32>
    %81 = math.exp %80 : vector<2x16x8xf32>
    %cst_55 = arith.constant dense<0.000000e+00> : vector<16x8xf32>
    %82 = vector.multi_reduction <add>, %81, %cst_55 [0] : vector<2x16x8xf32> to vector<16x8xf32>
    %83 = vector.shape_cast %82 : vector<16x8xf32> to vector<1x16x8xf32>
    %84 = vector.broadcast %83 : vector<1x16x8xf32> to vector<2x16x8xf32>
    %85 = arith.divf %81, %84 : vector<2x16x8xf32>
    %86 = vector.shape_cast %85 : vector<2x16x8xf32> to vector<32x8xf32>
    %cst_56 = arith.constant dense<0.000000e+00> : vector<32x32xf32>
    %87 = tpu.matmul %86, %1, %cst_56 {dimension_numbers = #tpu.dot_dimension_numbers<[1], [0], [0], [1], [0, 0, 1, 1], [], []>} : vector<32x8xf32>, vector<8x32xf32>, vector<32x32xf32> -> vector<32x32xf32>
    %88 = vector.shape_cast %87 : vector<32x32xf32> to vector<2x16x32xf32>
    %89 = arith.mulf %88, %46 : vector<2x16x32xf32>
    %cst_57 = arith.constant dense<0.000000e+00> : vector<16x32xf32>
    %90 = vector.multi_reduction <add>, %89, %cst_57 [0] : vector<2x16x32xf32> to vector<16x32xf32>
    %91 = tpu.concatenate %68, %90 in 0 : vector<16x32xf32>, vector<16x32xf32> -> vector<32x32xf32>
    %cst_58 = arith.constant dense<0.000000e+00> : vector<32x32xf32>
    %92 = tpu.matmul %91, %17, %cst_58 {dimension_numbers = #tpu.dot_dimension_numbers<[1], [0], [0], [1], [0, 0, 1, 1], [], []>} : vector<32x32xf32>, vector<32x32xf32>, vector<32x32xf32> -> vector<32x32xf32>
    %93 = vector.broadcast %19 : vector<1x32xf32> to vector<32x32xf32>
    %94 = arith.addf %92, %93 : vector<32x32xf32>
    %95 = arith.addf %11, %94 : vector<32x32xf32>
    %cst_59 = arith.constant dense<0.000000e+00> : vector<32xf32>
    %96 = vector.multi_reduction <add>, %95, %cst_59 [1] : vector<32x32xf32> to vector<32xf32>
    %97 = vector.shape_cast %96 : vector<32xf32> to vector<32x1xf32>
    %cst_60 = arith.constant 3.200000e+01 : f32
    %98 = vector.broadcast %cst_60 : f32 to vector<32x1xf32>
    %99 = arith.divf %97, %98 : vector<32x1xf32>
    %100 = vector.broadcast %99 : vector<32x1xf32> to vector<32x32xf32>
    %101 = arith.subf %95, %100 : vector<32x32xf32>
    %102 = arith.mulf %101, %101 : vector<32x32xf32>
    %cst_61 = arith.constant dense<0.000000e+00> : vector<32xf32>
    %103 = vector.multi_reduction <add>, %102, %cst_61 [1] : vector<32x32xf32> to vector<32xf32>
    %104 = vector.shape_cast %103 : vector<32xf32> to vector<32x1xf32>
    %cst_62 = arith.constant 3.200000e+01 : f32
    %105 = vector.broadcast %cst_62 : f32 to vector<32x1xf32>
    %106 = arith.divf %104, %105 : vector<32x1xf32>
    %cst_63 = arith.constant 9.99999974E-6 : f32
    %107 = vector.broadcast %cst_63 : f32 to vector<32x1xf32>
    %108 = arith.addf %106, %107 : vector<32x1xf32>
    %109 = math.rsqrt %108 : vector<32x1xf32>
    %110 = vector.broadcast %109 : vector<32x1xf32> to vector<32x32xf32>
    %111 = arith.mulf %101, %110 : vector<32x32xf32>
    %112 = vector.broadcast %21 : vector<1x32xf32> to vector<32x32xf32>
    %113 = arith.mulf %111, %112 : vector<32x32xf32>
    %114 = vector.broadcast %23 : vector<1x32xf32> to vector<32x32xf32>
    %115 = arith.addf %113, %114 : vector<32x32xf32>
    %cst_64 = arith.constant dense<0.000000e+00> : vector<32x64xf32>
    %116 = tpu.matmul %115, %25, %cst_64 {dimension_numbers = #tpu.dot_dimension_numbers<[1], [0], [0], [1], [0, 0, 1, 1], [], []>} : vector<32x32xf32>, vector<32x64xf32>, vector<32x64xf32> -> vector<32x64xf32>
    %117 = vector.broadcast %27 : vector<1x64xf32> to vector<32x64xf32>
    %118 = arith.addf %116, %117 : vector<32x64xf32>
    %cst_65 = arith.constant 0.000000e+00 : f32
    %119 = vector.broadcast %cst_65 : f32 to vector<32x64xf32>
    %120 = arith.maximumf %118, %119 : vector<32x64xf32>
    %cst_66 = arith.constant dense<0.000000e+00> : vector<32x32xf32>
    %121 = tpu.matmul %120, %29, %cst_66 {dimension_numbers = #tpu.dot_dimension_numbers<[1], [0], [0], [1], [0, 0, 1, 1], [], []>} : vector<32x64xf32>, vector<64x32xf32>, vector<32x32xf32> -> vector<32x32xf32>
    %122 = vector.broadcast %31 : vector<1x32xf32> to vector<32x32xf32>
    %123 = arith.addf %121, %122 : vector<32x32xf32>
    %124 = arith.addf %115, %123 : vector<32x32xf32>
    %cst_67 = arith.constant dense<0.000000e+00> : vector<32xf32>
    %125 = vector.multi_reduction <add>, %124, %cst_67 [1] : vector<32x32xf32> to vector<32xf32>
    %126 = vector.shape_cast %125 : vector<32xf32> to vector<32x1xf32>
    %cst_68 = arith.constant 3.200000e+01 : f32
    %127 = vector.broadcast %cst_68 : f32 to vector<32x1xf32>
    %128 = arith.divf %126, %127 : vector<32x1xf32>
    %129 = vector.broadcast %128 : vector<32x1xf32> to vector<32x32xf32>
    %130 = arith.subf %124, %129 : vector<32x32xf32>
    %131 = arith.mulf %130, %130 : vector<32x32xf32>
    %cst_69 = arith.constant dense<0.000000e+00> : vector<32xf32>
    %132 = vector.multi_reduction <add>, %131, %cst_69 [1] : vector<32x32xf32> to vector<32xf32>
    %133 = vector.shape_cast %132 : vector<32xf32> to vector<32x1xf32>
    %cst_70 = arith.constant 3.200000e+01 : f32
    %134 = vector.broadcast %cst_70 : f32 to vector<32x1xf32>
    %135 = arith.divf %133, %134 : vector<32x1xf32>
    %cst_71 = arith.constant 9.99999974E-6 : f32
    %136 = vector.broadcast %cst_71 : f32 to vector<32x1xf32>
    %137 = arith.addf %135, %136 : vector<32x1xf32>
    %138 = math.rsqrt %137 : vector<32x1xf32>
    %139 = vector.broadcast %138 : vector<32x1xf32> to vector<32x32xf32>
    %140 = arith.mulf %130, %139 : vector<32x32xf32>
    %141 = vector.broadcast %33 : vector<1x32xf32> to vector<32x32xf32>
    %142 = arith.mulf %140, %141 : vector<32x32xf32>
    %143 = vector.broadcast %35 : vector<1x32xf32> to vector<32x32xf32>
    %144 = arith.addf %142, %143 : vector<32x32xf32>
    %c1 = arith.constant 1 : index
    %c0_72 = arith.constant 0 : index
    %c0_73 = arith.constant 0 : index
    %145 = vector.load %arg6[%c1, %c0_72, %c0_73] : memref<2x32x96xf32, #tpu.memory_space<vmem>>, vector<1x32x96xf32>
    %146 = vector.shape_cast %145 : vector<1x32x96xf32> to vector<32x96xf32>
    %c1_74 = arith.constant 1 : index
    %c0_75 = arith.constant 0 : index
    %c0_76 = arith.constant 0 : index
    %147 = vector.load %arg7[%c1_74, %c0_75, %c0_76] : memref<2x1x96xf32, #tpu.memory_space<vmem>>, vector<1x1x96xf32>
    %148 = vector.shape_cast %147 : vector<1x1x96xf32> to vector<1x96xf32>
    %c1_77 = arith.constant 1 : index
    %c0_78 = arith.constant 0 : index
    %c0_79 = arith.constant 0 : index
    %149 = vector.load %arg8[%c1_77, %c0_78, %c0_79] : memref<2x32x32xf32, #tpu.memory_space<vmem>>, vector<1x32x32xf32>
    %150 = vector.shape_cast %149 : vector<1x32x32xf32> to vector<32x32xf32>
    %c1_80 = arith.constant 1 : index
    %c0_81 = arith.constant 0 : index
    %c0_82 = arith.constant 0 : index
    %151 = vector.load %arg9[%c1_80, %c0_81, %c0_82] : memref<2x1x32xf32, #tpu.memory_space<vmem>>, vector<1x1x32xf32>
    %152 = vector.shape_cast %151 : vector<1x1x32xf32> to vector<1x32xf32>
    %c1_83 = arith.constant 1 : index
    %c0_84 = arith.constant 0 : index
    %c0_85 = arith.constant 0 : index
    %153 = vector.load %arg10[%c1_83, %c0_84, %c0_85] : memref<2x1x32xf32, #tpu.memory_space<vmem>>, vector<1x1x32xf32>
    %154 = vector.shape_cast %153 : vector<1x1x32xf32> to vector<1x32xf32>
    %c1_86 = arith.constant 1 : index
    %c0_87 = arith.constant 0 : index
    %c0_88 = arith.constant 0 : index
    %155 = vector.load %arg11[%c1_86, %c0_87, %c0_88] : memref<2x1x32xf32, #tpu.memory_space<vmem>>, vector<1x1x32xf32>
    %156 = vector.shape_cast %155 : vector<1x1x32xf32> to vector<1x32xf32>
    %c1_89 = arith.constant 1 : index
    %c0_90 = arith.constant 0 : index
    %c0_91 = arith.constant 0 : index
    %157 = vector.load %arg12[%c1_89, %c0_90, %c0_91] : memref<2x32x64xf32, #tpu.memory_space<vmem>>, vector<1x32x64xf32>
    %158 = vector.shape_cast %157 : vector<1x32x64xf32> to vector<32x64xf32>
    %c1_92 = arith.constant 1 : index
    %c0_93 = arith.constant 0 : index
    %c0_94 = arith.constant 0 : index
    %159 = vector.load %arg13[%c1_92, %c0_93, %c0_94] : memref<2x1x64xf32, #tpu.memory_space<vmem>>, vector<1x1x64xf32>
    %160 = vector.shape_cast %159 : vector<1x1x64xf32> to vector<1x64xf32>
    %c1_95 = arith.constant 1 : index
    %c0_96 = arith.constant 0 : index
    %c0_97 = arith.constant 0 : index
    %161 = vector.load %arg14[%c1_95, %c0_96, %c0_97] : memref<2x64x32xf32, #tpu.memory_space<vmem>>, vector<1x64x32xf32>
    %162 = vector.shape_cast %161 : vector<1x64x32xf32> to vector<64x32xf32>
    %c1_98 = arith.constant 1 : index
    %c0_99 = arith.constant 0 : index
    %c0_100 = arith.constant 0 : index
    %163 = vector.load %arg15[%c1_98, %c0_99, %c0_100] : memref<2x1x32xf32, #tpu.memory_space<vmem>>, vector<1x1x32xf32>
    %164 = vector.shape_cast %163 : vector<1x1x32xf32> to vector<1x32xf32>
    %c1_101 = arith.constant 1 : index
    %c0_102 = arith.constant 0 : index
    %c0_103 = arith.constant 0 : index
    %165 = vector.load %arg16[%c1_101, %c0_102, %c0_103] : memref<2x1x32xf32, #tpu.memory_space<vmem>>, vector<1x1x32xf32>
    %166 = vector.shape_cast %165 : vector<1x1x32xf32> to vector<1x32xf32>
    %c1_104 = arith.constant 1 : index
    %c0_105 = arith.constant 0 : index
    %c0_106 = arith.constant 0 : index
    %167 = vector.load %arg17[%c1_104, %c0_105, %c0_106] : memref<2x1x32xf32, #tpu.memory_space<vmem>>, vector<1x1x32xf32>
    %168 = vector.shape_cast %167 : vector<1x1x32xf32> to vector<1x32xf32>
    %cst_107 = arith.constant dense<0.000000e+00> : vector<32x96xf32>
    %169 = tpu.matmul %144, %146, %cst_107 {dimension_numbers = #tpu.dot_dimension_numbers<[1], [0], [0], [1], [0, 0, 1, 1], [], []>} : vector<32x32xf32>, vector<32x96xf32>, vector<32x96xf32> -> vector<32x96xf32>
    %170 = vector.broadcast %148 : vector<1x96xf32> to vector<32x96xf32>
    %171 = arith.addf %169, %170 : vector<32x96xf32>
    %172 = vector.extract_strided_slice %171 {offsets = [0, 0], sizes = [32, 32], strides = [1, 1]} : vector<32x96xf32> to vector<32x32xf32>
    %cst_108 = arith.constant 5.000000e-01 : f32
    %173 = vector.broadcast %cst_108 : f32 to vector<32x32xf32>
    %174 = arith.mulf %172, %173 : vector<32x32xf32>
    %175 = vector.shape_cast %174 : vector<32x32xf32> to vector<2x16x32xf32>
    %176 = vector.extract_strided_slice %171 {offsets = [0, 32], sizes = [32, 32], strides = [1, 1]} : vector<32x96xf32> to vector<32x32xf32>
    %177 = vector.shape_cast %176 : vector<32x32xf32> to vector<2x16x32xf32>
    %178 = vector.extract_strided_slice %171 {offsets = [0, 64], sizes = [32, 32], strides = [1, 1]} : vector<32x96xf32> to vector<32x32xf32>
    %179 = vector.shape_cast %178 : vector<32x32xf32> to vector<2x16x32xf32>
    %180 = vector.extract_strided_slice %175 {offsets = [0, 0, 0], sizes = [1, 16, 32], strides = [1, 1, 1]} : vector<2x16x32xf32> to vector<1x16x32xf32>
    %181 = vector.shape_cast %180 : vector<1x16x32xf32> to vector<16x32xf32>
    %182 = vector.shape_cast %181 : vector<16x32xf32> to vector<1x16x32xf32>
    %183 = vector.broadcast %182 : vector<1x16x32xf32> to vector<2x16x32xf32>
    %184 = arith.mulf %183, %177 : vector<2x16x32xf32>
    %185 = vector.shape_cast %184 : vector<2x16x32xf32> to vector<32x32xf32>
    %cst_109 = arith.constant dense<0.000000e+00> : vector<32x8xf32>
    %186 = tpu.matmul %185, %0, %cst_109 {dimension_numbers = #tpu.dot_dimension_numbers<[1], [0], [0], [1], [0, 0, 1, 1], [], []>} : vector<32x32xf32>, vector<32x8xf32>, vector<32x8xf32> -> vector<32x8xf32>
    %187 = vector.shape_cast %186 : vector<32x8xf32> to vector<2x16x8xf32>
    %cst_110 = arith.constant dense<0xFF800000> : vector<16x8xf32>
    %188 = vector.multi_reduction <maximumf>, %187, %cst_110 [0] : vector<2x16x8xf32> to vector<16x8xf32>
    %189 = vector.shape_cast %188 : vector<16x8xf32> to vector<1x16x8xf32>
    %190 = vector.broadcast %189 : vector<1x16x8xf32> to vector<2x16x8xf32>
    %191 = arith.subf %187, %190 : vector<2x16x8xf32>
    %192 = math.exp %191 : vector<2x16x8xf32>
    %cst_111 = arith.constant dense<0.000000e+00> : vector<16x8xf32>
    %193 = vector.multi_reduction <add>, %192, %cst_111 [0] : vector<2x16x8xf32> to vector<16x8xf32>
    %194 = vector.shape_cast %193 : vector<16x8xf32> to vector<1x16x8xf32>
    %195 = vector.broadcast %194 : vector<1x16x8xf32> to vector<2x16x8xf32>
    %196 = arith.divf %192, %195 : vector<2x16x8xf32>
    %197 = vector.shape_cast %196 : vector<2x16x8xf32> to vector<32x8xf32>
    %cst_112 = arith.constant dense<0.000000e+00> : vector<32x32xf32>
    %198 = tpu.matmul %197, %1, %cst_112 {dimension_numbers = #tpu.dot_dimension_numbers<[1], [0], [0], [1], [0, 0, 1, 1], [], []>} : vector<32x8xf32>, vector<8x32xf32>, vector<32x32xf32> -> vector<32x32xf32>
    %199 = vector.shape_cast %198 : vector<32x32xf32> to vector<2x16x32xf32>
    %200 = arith.mulf %199, %179 : vector<2x16x32xf32>
    %cst_113 = arith.constant dense<0.000000e+00> : vector<16x32xf32>
    %201 = vector.multi_reduction <add>, %200, %cst_113 [0] : vector<2x16x32xf32> to vector<16x32xf32>
    %202 = vector.extract_strided_slice %175 {offsets = [1, 0, 0], sizes = [1, 16, 32], strides = [1, 1, 1]} : vector<2x16x32xf32> to vector<1x16x32xf32>
    %203 = vector.shape_cast %202 : vector<1x16x32xf32> to vector<16x32xf32>
    %204 = vector.shape_cast %203 : vector<16x32xf32> to vector<1x16x32xf32>
    %205 = vector.broadcast %204 : vector<1x16x32xf32> to vector<2x16x32xf32>
    %206 = arith.mulf %205, %177 : vector<2x16x32xf32>
    %207 = vector.shape_cast %206 : vector<2x16x32xf32> to vector<32x32xf32>
    %cst_114 = arith.constant dense<0.000000e+00> : vector<32x8xf32>
    %208 = tpu.matmul %207, %0, %cst_114 {dimension_numbers = #tpu.dot_dimension_numbers<[1], [0], [0], [1], [0, 0, 1, 1], [], []>} : vector<32x32xf32>, vector<32x8xf32>, vector<32x8xf32> -> vector<32x8xf32>
    %209 = vector.shape_cast %208 : vector<32x8xf32> to vector<2x16x8xf32>
    %cst_115 = arith.constant dense<0xFF800000> : vector<16x8xf32>
    %210 = vector.multi_reduction <maximumf>, %209, %cst_115 [0] : vector<2x16x8xf32> to vector<16x8xf32>
    %211 = vector.shape_cast %210 : vector<16x8xf32> to vector<1x16x8xf32>
    %212 = vector.broadcast %211 : vector<1x16x8xf32> to vector<2x16x8xf32>
    %213 = arith.subf %209, %212 : vector<2x16x8xf32>
    %214 = math.exp %213 : vector<2x16x8xf32>
    %cst_116 = arith.constant dense<0.000000e+00> : vector<16x8xf32>
    %215 = vector.multi_reduction <add>, %214, %cst_116 [0] : vector<2x16x8xf32> to vector<16x8xf32>
    %216 = vector.shape_cast %215 : vector<16x8xf32> to vector<1x16x8xf32>
    %217 = vector.broadcast %216 : vector<1x16x8xf32> to vector<2x16x8xf32>
    %218 = arith.divf %214, %217 : vector<2x16x8xf32>
    %219 = vector.shape_cast %218 : vector<2x16x8xf32> to vector<32x8xf32>
    %cst_117 = arith.constant dense<0.000000e+00> : vector<32x32xf32>
    %220 = tpu.matmul %219, %1, %cst_117 {dimension_numbers = #tpu.dot_dimension_numbers<[1], [0], [0], [1], [0, 0, 1, 1], [], []>} : vector<32x8xf32>, vector<8x32xf32>, vector<32x32xf32> -> vector<32x32xf32>
    %221 = vector.shape_cast %220 : vector<32x32xf32> to vector<2x16x32xf32>
    %222 = arith.mulf %221, %179 : vector<2x16x32xf32>
    %cst_118 = arith.constant dense<0.000000e+00> : vector<16x32xf32>
    %223 = vector.multi_reduction <add>, %222, %cst_118 [0] : vector<2x16x32xf32> to vector<16x32xf32>
    %224 = tpu.concatenate %201, %223 in 0 : vector<16x32xf32>, vector<16x32xf32> -> vector<32x32xf32>
    %cst_119 = arith.constant dense<0.000000e+00> : vector<32x32xf32>
    %225 = tpu.matmul %224, %150, %cst_119 {dimension_numbers = #tpu.dot_dimension_numbers<[1], [0], [0], [1], [0, 0, 1, 1], [], []>} : vector<32x32xf32>, vector<32x32xf32>, vector<32x32xf32> -> vector<32x32xf32>
    %226 = vector.broadcast %152 : vector<1x32xf32> to vector<32x32xf32>
    %227 = arith.addf %225, %226 : vector<32x32xf32>
    %228 = arith.addf %144, %227 : vector<32x32xf32>
    %cst_120 = arith.constant dense<0.000000e+00> : vector<32xf32>
    %229 = vector.multi_reduction <add>, %228, %cst_120 [1] : vector<32x32xf32> to vector<32xf32>
    %230 = vector.shape_cast %229 : vector<32xf32> to vector<32x1xf32>
    %cst_121 = arith.constant 3.200000e+01 : f32
    %231 = vector.broadcast %cst_121 : f32 to vector<32x1xf32>
    %232 = arith.divf %230, %231 : vector<32x1xf32>
    %233 = vector.broadcast %232 : vector<32x1xf32> to vector<32x32xf32>
    %234 = arith.subf %228, %233 : vector<32x32xf32>
    %235 = arith.mulf %234, %234 : vector<32x32xf32>
    %cst_122 = arith.constant dense<0.000000e+00> : vector<32xf32>
    %236 = vector.multi_reduction <add>, %235, %cst_122 [1] : vector<32x32xf32> to vector<32xf32>
    %237 = vector.shape_cast %236 : vector<32xf32> to vector<32x1xf32>
    %cst_123 = arith.constant 3.200000e+01 : f32
    %238 = vector.broadcast %cst_123 : f32 to vector<32x1xf32>
    %239 = arith.divf %237, %238 : vector<32x1xf32>
    %cst_124 = arith.constant 9.99999974E-6 : f32
    %240 = vector.broadcast %cst_124 : f32 to vector<32x1xf32>
    %241 = arith.addf %239, %240 : vector<32x1xf32>
    %242 = math.rsqrt %241 : vector<32x1xf32>
    %243 = vector.broadcast %242 : vector<32x1xf32> to vector<32x32xf32>
    %244 = arith.mulf %234, %243 : vector<32x32xf32>
    %245 = vector.broadcast %154 : vector<1x32xf32> to vector<32x32xf32>
    %246 = arith.mulf %244, %245 : vector<32x32xf32>
    %247 = vector.broadcast %156 : vector<1x32xf32> to vector<32x32xf32>
    %248 = arith.addf %246, %247 : vector<32x32xf32>
    %cst_125 = arith.constant dense<0.000000e+00> : vector<32x64xf32>
    %249 = tpu.matmul %248, %158, %cst_125 {dimension_numbers = #tpu.dot_dimension_numbers<[1], [0], [0], [1], [0, 0, 1, 1], [], []>} : vector<32x32xf32>, vector<32x64xf32>, vector<32x64xf32> -> vector<32x64xf32>
    %250 = vector.broadcast %160 : vector<1x64xf32> to vector<32x64xf32>
    %251 = arith.addf %249, %250 : vector<32x64xf32>
    %cst_126 = arith.constant 0.000000e+00 : f32
    %252 = vector.broadcast %cst_126 : f32 to vector<32x64xf32>
    %253 = arith.maximumf %251, %252 : vector<32x64xf32>
    %cst_127 = arith.constant dense<0.000000e+00> : vector<32x32xf32>
    %254 = tpu.matmul %253, %162, %cst_127 {dimension_numbers = #tpu.dot_dimension_numbers<[1], [0], [0], [1], [0, 0, 1, 1], [], []>} : vector<32x64xf32>, vector<64x32xf32>, vector<32x32xf32> -> vector<32x32xf32>
    %255 = vector.broadcast %164 : vector<1x32xf32> to vector<32x32xf32>
    %256 = arith.addf %254, %255 : vector<32x32xf32>
    %257 = arith.addf %248, %256 : vector<32x32xf32>
    %cst_128 = arith.constant dense<0.000000e+00> : vector<32xf32>
    %258 = vector.multi_reduction <add>, %257, %cst_128 [1] : vector<32x32xf32> to vector<32xf32>
    %259 = vector.shape_cast %258 : vector<32xf32> to vector<32x1xf32>
    %cst_129 = arith.constant 3.200000e+01 : f32
    %260 = vector.broadcast %cst_129 : f32 to vector<32x1xf32>
    %261 = arith.divf %259, %260 : vector<32x1xf32>
    %262 = vector.broadcast %261 : vector<32x1xf32> to vector<32x32xf32>
    %263 = arith.subf %257, %262 : vector<32x32xf32>
    %264 = arith.mulf %263, %263 : vector<32x32xf32>
    %cst_130 = arith.constant dense<0.000000e+00> : vector<32xf32>
    %265 = vector.multi_reduction <add>, %264, %cst_130 [1] : vector<32x32xf32> to vector<32xf32>
    %266 = vector.shape_cast %265 : vector<32xf32> to vector<32x1xf32>
    %cst_131 = arith.constant 3.200000e+01 : f32
    %267 = vector.broadcast %cst_131 : f32 to vector<32x1xf32>
    %268 = arith.divf %266, %267 : vector<32x1xf32>
    %cst_132 = arith.constant 9.99999974E-6 : f32
    %269 = vector.broadcast %cst_132 : f32 to vector<32x1xf32>
    %270 = arith.addf %268, %269 : vector<32x1xf32>
    %271 = math.rsqrt %270 : vector<32x1xf32>
    %272 = vector.broadcast %271 : vector<32x1xf32> to vector<32x32xf32>
    %273 = arith.mulf %263, %272 : vector<32x32xf32>
    %274 = vector.broadcast %166 : vector<1x32xf32> to vector<32x32xf32>
    %275 = arith.mulf %273, %274 : vector<32x32xf32>
    %276 = vector.broadcast %168 : vector<1x32xf32> to vector<32x32xf32>
    %277 = arith.addf %275, %276 : vector<32x32xf32>
    %278 = vector.shape_cast %277 : vector<32x32xf32> to vector<2x16x32xf32>
    %cst_133 = arith.constant dense<0.000000e+00> : vector<2x32xf32>
    %279 = vector.multi_reduction <add>, %278, %cst_133 [1] : vector<2x16x32xf32> to vector<2x32xf32>
    %cst_134 = arith.constant 1.600000e+01 : f32
    %280 = vector.broadcast %cst_134 : f32 to vector<2x32xf32>
    %281 = arith.divf %279, %280 : vector<2x32xf32>
    %c0_135 = arith.constant 0 : index
    %c0_136 = arith.constant 0 : index
    %282 = vector.load %arg18[%c0_135, %c0_136] : memref<1x32xf32, #tpu.memory_space<vmem>>, vector<1x32xf32>
    %c0_137 = arith.constant 0 : index
    %c0_138 = arith.constant 0 : index
    %283 = vector.load %arg19[%c0_137, %c0_138] : memref<1x32xf32, #tpu.memory_space<vmem>>, vector<1x32xf32>
    %cst_139 = arith.constant dense<0.000000e+00> : vector<2xf32>
    %284 = vector.multi_reduction <add>, %281, %cst_139 [1] : vector<2x32xf32> to vector<2xf32>
    %285 = vector.shape_cast %284 : vector<2xf32> to vector<2x1xf32>
    %cst_140 = arith.constant 3.200000e+01 : f32
    %286 = vector.broadcast %cst_140 : f32 to vector<2x1xf32>
    %287 = arith.divf %285, %286 : vector<2x1xf32>
    %288 = vector.broadcast %287 : vector<2x1xf32> to vector<2x32xf32>
    %289 = arith.subf %281, %288 : vector<2x32xf32>
    %290 = arith.mulf %289, %289 : vector<2x32xf32>
    %cst_141 = arith.constant dense<0.000000e+00> : vector<2xf32>
    %291 = vector.multi_reduction <add>, %290, %cst_141 [1] : vector<2x32xf32> to vector<2xf32>
    %292 = vector.shape_cast %291 : vector<2xf32> to vector<2x1xf32>
    %cst_142 = arith.constant 3.200000e+01 : f32
    %293 = vector.broadcast %cst_142 : f32 to vector<2x1xf32>
    %294 = arith.divf %292, %293 : vector<2x1xf32>
    %cst_143 = arith.constant 9.99999974E-6 : f32
    %295 = vector.broadcast %cst_143 : f32 to vector<2x1xf32>
    %296 = arith.addf %294, %295 : vector<2x1xf32>
    %297 = math.rsqrt %296 : vector<2x1xf32>
    %298 = vector.broadcast %297 : vector<2x1xf32> to vector<2x32xf32>
    %299 = arith.mulf %289, %298 : vector<2x32xf32>
    %300 = vector.broadcast %282 : vector<1x32xf32> to vector<2x32xf32>
    %301 = arith.mulf %299, %300 : vector<2x32xf32>
    %302 = vector.broadcast %283 : vector<1x32xf32> to vector<2x32xf32>
    %303 = arith.addf %301, %302 : vector<2x32xf32>
    %c0_144 = arith.constant 0 : index
    %c0_145 = arith.constant 0 : index
    %304 = vector.load %arg20[%c0_144, %c0_145] : memref<32x10xf32, #tpu.memory_space<vmem>>, vector<32x10xf32>
    %cst_146 = arith.constant dense<0.000000e+00> : vector<2x10xf32>
    %305 = tpu.matmul %303, %304, %cst_146 {dimension_numbers = #tpu.dot_dimension_numbers<[1], [0], [0], [1], [0, 0, 1, 1], [], []>} : vector<2x32xf32>, vector<32x10xf32>, vector<2x10xf32> -> vector<2x10xf32>
    %c0_147 = arith.constant 0 : index
    %c0_148 = arith.constant 0 : index
    %306 = vector.load %arg21[%c0_147, %c0_148] : memref<1x10xf32, #tpu.memory_space<vmem>>, vector<1x10xf32>
    %307 = vector.broadcast %306 : vector<1x10xf32> to vector<2x10xf32>
    %308 = arith.addf %305, %307 : vector<2x10xf32>
    %c0_149 = arith.constant 0 : index
    %c0_150 = arith.constant 0 : index
    %309 = vector.load %arg22[%c0_149, %c0_150] : memref<2x10xf32, #tpu.memory_space<vmem>>, vector<2x10xf32>
    tpu.vector_store %arg22[%c0_149, %c0_150], %308 {strides = array<i32>} : memref<2x10xf32, #tpu.memory_space<vmem>>, vector<2x10xf32>,
    return
  }
  func.func @transform_0(%arg0: i32) -> (i32, i32, i32) {
    %c0_i32 = arith.constant 0 : i32
    %c0_i32_0 = arith.constant 0 : i32
    %c0_i32_1 = arith.constant 0 : i32
    %c0_i32_2 = arith.constant 0 : i32
    return %c0_i32, %c0_i32_0, %c0_i32_1 : i32, i32, i32
  }
  func.func @transform_1(%arg0: i32) -> (i32, i32) {
    %c0_i32 = arith.constant 0 : i32
    %c0_i32_0 = arith.constant 0 : i32
    %c0_i32_1 = arith.constant 0 : i32
    return %c0_i32, %c0_i32_0 : i32, i32
  }
  func.func @transform_2(%arg0: i32) -> (i32, i32) {
    %c0_i32 = arith.constant 0 : i32
    %c0_i32_0 = arith.constant 0 : i32
    %c0_i32_1 = arith.constant 0 : i32
    return %c0_i32, %c0_i32_0 : i32, i32
  }
  func.func @transform_3(%arg0: i32) -> (i32, i32) {
    %c0_i32 = arith.constant 0 : i32
    %c0_i32_0 = arith.constant 0 : i32
    %c0_i32_1 = arith.constant 0 : i32
    return %c0_i32, %c0_i32_0 : i32, i32
  }
  func.func @transform_4(%arg0: i32) -> (i32, i32) {
    %c0_i32 = arith.constant 0 : i32
    %c0_i32_0 = arith.constant 0 : i32
    %c0_i32_1 = arith.constant 0 : i32
    return %c0_i32, %c0_i32_0 : i32, i32
  }
  func.func @transform_5(%arg0: i32) -> (i32, i32, i32) {
    %c0_i32 = arith.constant 0 : i32
    %c0_i32_0 = arith.constant 0 : i32
    %c0_i32_1 = arith.constant 0 : i32
    %c0_i32_2 = arith.constant 0 : i32
    return %c0_i32, %c0_i32_0, %c0_i32_1 : i32, i32, i32
  }
  func.func @transform_6(%arg0: i32) -> (i32, i32, i32) {
    %c0_i32 = arith.constant 0 : i32
    %c0_i32_0 = arith.constant 0 : i32
    %c0_i32_1 = arith.constant 0 : i32
    %c0_i32_2 = arith.constant 0 : i32
    return %c0_i32, %c0_i32_0, %c0_i32_1 : i32, i32, i32
  }
  func.func @transform_7(%arg0: i32) -> (i32, i32, i32) {
    %c0_i32 = arith.constant 0 : i32
    %c0_i32_0 = arith.constant 0 : i32
    %c0_i32_1 = arith.constant 0 : i32
    %c0_i32_2 = arith.constant 0 : i32
    return %c0_i32, %c0_i32_0, %c0_i32_1 : i32, i32, i32
  }
  func.func @transform_8(%arg0: i32) -> (i32, i32, i32) {
    %c0_i32 = arith.constant 0 : i32
    %c0_i32_0 = arith.constant 0 : i32
    %c0_i32_1 = arith.constant 0 : i32
    %c0_i32_2 = arith.constant 0 : i32
    return %c0_i32, %c0_i32_0, %c0_i32_1 : i32, i32, i32
  }
  func.func @transform_9(%arg0: i32) -> (i32, i32, i32) {
    %c0_i32 = arith.constant 0 : i32
    %c0_i32_0 = arith.constant 0 : i32
    %c0_i32_1 = arith.constant 0 : i32
    %c0_i32_2 = arith.constant 0 : i32
    return %c0_i32, %c0_i32_0, %c0_i32_1 : i32, i32, i32
  }
  func.func @transform_10(%arg0: i32) -> (i32, i32, i32) {
    %c0_i32 = arith.constant 0 : i32
    %c0_i32_0 = arith.constant 0 : i32
    %c0_i32_1 = arith.constant 0 : i32
    %c0_i32_2 = arith.constant 0 : i32
    return %c0_i32, %c0_i32_0, %c0_i32_1 : i32, i32, i32
  }
  func.func @transform_11(%arg0: i32) -> (i32, i32, i32) {
    %c0_i32 = arith.constant 0 : i32
    %c0_i32_0 = arith.constant 0 : i32
    %c0_i32_1 = arith.constant 0 : i32
    %c0_i32_2 = arith.constant 0 : i32
    return %c0_i32, %c0_i32_0, %c0_i32_1 : i32, i32, i32
  }
  func.func @transform_12(%arg0: i32) -> (i32, i32, i32) {
    %c0_i32 = arith.constant 0 : i32
    %c0_i32_0 = arith.constant 0 : i32
    %c0_i32_1 = arith.constant 0 : i32
    %c0_i32_2 = arith.constant 0 : i32
    return %c0_i32, %c0_i32_0, %c0_i32_1 : i32, i32, i32
  }
  func.func @transform_13(%arg0: i32) -> (i32, i32, i32) {
    %c0_i32 = arith.constant 0 : i32
    %c0_i32_0 = arith.constant 0 : i32
    %c0_i32_1 = arith.constant 0 : i32
    %c0_i32_2 = arith.constant 0 : i32
    return %c0_i32, %c0_i32_0, %c0_i32_1 : i32, i32, i32
  }
  func.func @transform_14(%arg0: i32) -> (i32, i32, i32) {
    %c0_i32 = arith.constant 0 : i32
    %c0_i32_0 = arith.constant 0 : i32
    %c0_i32_1 = arith.constant 0 : i32
    %c0_i32_2 = arith.constant 0 : i32
    return %c0_i32, %c0_i32_0, %c0_i32_1 : i32, i32, i32
  }
  func.func @transform_15(%arg0: i32) -> (i32, i32, i32) {
    %c0_i32 = arith.constant 0 : i32
    %c0_i32_0 = arith.constant 0 : i32
    %c0_i32_1 = arith.constant 0 : i32
    %c0_i32_2 = arith.constant 0 : i32
    return %c0_i32, %c0_i32_0, %c0_i32_1 : i32, i32, i32
  }
  func.func @transform_16(%arg0: i32) -> (i32, i32, i32) {
    %c0_i32 = arith.constant 0 : i32
    %c0_i32_0 = arith.constant 0 : i32
    %c0_i32_1 = arith.constant 0 : i32
    %c0_i32_2 = arith.constant 0 : i32
    return %c0_i32, %c0_i32_0, %c0_i32_1 : i32, i32, i32
  }
  func.func @transform_17(%arg0: i32) -> (i32, i32) {
    %c0_i32 = arith.constant 0 : i32
    %c0_i32_0 = arith.constant 0 : i32
    %c0_i32_1 = arith.constant 0 : i32
    return %c0_i32, %c0_i32_0 : i32, i32
  }
  func.func @transform_18(%arg0: i32) -> (i32, i32) {
    %c0_i32 = arith.constant 0 : i32
    %c0_i32_0 = arith.constant 0 : i32
    %c0_i32_1 = arith.constant 0 : i32
    return %c0_i32, %c0_i32_0 : i32, i32
  }
  func.func @transform_19(%arg0: i32) -> (i32, i32) {
    %c0_i32 = arith.constant 0 : i32
    %c0_i32_0 = arith.constant 0 : i32
    %c0_i32_1 = arith.constant 0 : i32
    return %c0_i32, %c0_i32_0 : i32, i32
  }
  func.func @transform_20(%arg0: i32) -> (i32, i32) {
    %c0_i32 = arith.constant 0 : i32
    %c0_i32_0 = arith.constant 0 : i32
    %c0_i32_1 = arith.constant 0 : i32
    return %c0_i32, %c0_i32_0 : i32, i32
  }
  func.func @transform_21(%arg0: i32) -> (i32, i32) {
    %c0_i32 = arith.constant 0 : i32
    %c0_i32_0 = arith.constant 0 : i32
    %c0_i32_1 = arith.constant 0 : i32
    return %c0_i32, %c0_i32_0 : i32, i32
  }
}

</mosaic_0001>

<bundles_post_ra>
// kernel: tpu_custom_call.1
= control target key start
LH: loop header
LB: loop body
LE: loop exit
PB: predicated region body
PF: predicated region fallthrough
CT: control target
= control target key end

     0   :  { %s3165_s0 = inlined_call_operand.hbm [shape: f32[2,16,32], index: 0, kind: input, shape index: {}]   ;;  %s3166_s1 = inlined_call_operand.hbm [shape: f32[32,32], index: 1, kind: input, shape index: {}]   ;;  %s3167_s2 = inlined_call_operand.vmem [shape: f32[16,32], index: 2, kind: input, shape index: {}]   ;;  %s3168_s3 = inlined_call_operand.vmem [shape: f32[32,8], index: 3, kind: input, shape index: {}]   ;;  %s3169_s4 = inlined_call_operand.hbm [shape: f32[8,32], index: 4, kind: input, shape index: {}]   ;;  %s3170_s5 = inlined_call_operand.vmem [shape: f32[2,32,96], index: 5, kind: input, shape index: {}]   ;;  %s3171_s6 = inlined_call_operand.vmem [shape: f32[2,1,96], index: 6, kind: input, shape index: {}]   ;;  %s3172_s7 = inlined_call_operand.vmem [shape: f32[2,32,32], index: 7, kind: input, shape index: {}]   ;;  %s3173_s8 = inlined_call_operand.vmem [shape: f32[2,1,32], index: 8, kind: input, shape index: {}]   ;;  %s3174_s9 = inlined_call_operand.hbm [shape: f32[2,1,32], index: 9, kind: input, shape index: {}]   ;;  %s3175_s10 = inlined_call_operand.hbm [shape: f32[2,1,32], index: 10, kind: input, shape index: {}]   ;;  %s3176_s11 = inlined_call_operand.vmem [shape: f32[2,32,64], index: 11, kind: input, shape index: {}]   ;;  %s3177_s12 = inlined_call_operand.hbm [shape: f32[2,1,64], index: 12, kind: input, shape index: {}]   ;;  %s3178_s13 = inlined_call_operand.vmem [shape: f32[2,64,32], index: 13, kind: input, shape index: {}]   ;;  %s3179_s14 = inlined_call_operand.hbm [shape: f32[2,1,32], index: 14, kind: input, shape index: {}]   ;;  %s3180_s15 = inlined_call_operand.hbm [shape: f32[2,1,32], index: 15, kind: input, shape index: {}]   ;;  %s3181_s16 = inlined_call_operand.vmem [shape: f32[2,1,32], index: 16, kind: input, shape index: {}]   ;;  %s3182_s17 = inlined_call_operand.vmem [shape: f32[1,32], index: 17, kind: input, shape index: {}]   ;;  %s3183_s18 = inlined_call_operand.hbm [shape: f32[1,32], index: 18, kind: input, shape index: {}]   ;;  %s3184_s19 = inlined_call_operand.vmem [shape: f32[32,10], index: 19, kind: input, shape index: {}]   ;;  %s3185_s20 = inlined_call_operand.vmem [shape: f32[1,10], index: 20, kind: input, shape index: {}]   ;;  %s3186_s21 = inlined_call_operand.hbm [shape: f32[2,10], index: 21, kind: output, shape index: {}]  }
   0x1   :  { %3191 = sst [smem:[#allocation24_spill]] %s3165_s0 }
   0x2   :  { %3192 = sst [smem:[#allocation25_spill]] %s3166_s1 }
   0x3   :  { %3193 = sst [smem:[#allocation26_spill]] %s3167_s2 }
   0x4   :  { %3194 = sst [smem:[#allocation27_spill]] %s3168_s3 }
   0x5   :  { %3195 = sst [smem:[#allocation28_spill]] %s3169_s4 }
   0x6   :  { %3196 = sst [smem:[#allocation29_spill]] %s3170_s5 }
   0x7   :  { %26 = vsyncpa [#allocation3], 0 }
   0x8   :  { %27 = vsyncpa [#allocation6], 0 }
   0x9   :  { %28 = vsyncpa [#allocation9], 0 }
   0xa   :  { %29 = vsyncpa [#allocation12], 0 }
   0xb   :  { %30 = vsyncpa [#allocation15], 0 }
   0xc   :  { %31 = vsyncpa [#allocation4], 0  ;;  %s3197_s26 = sld [smem:[#allocation25_spill]]  ;;  %s2411_s3 = smov [#allocation5]  }
   0xd   :  { %s51_s28 = sshll.u32 %s2411_s3, 4  ;;  %s85_s4 = sshll.u32 %s3174_s9, 4  ;;  %s52_s28 = int_to_ptr.vmem [resolvable:$true] %s51_s28  ;;  %s86_s4 = int_to_ptr.hbm [resolvable:$true] %s85_s4 }
   0xe   :  { %s3190_s30 = smov 128   ;;  %s2413_s5 = smov 8  }
   0xf   :  { %s2414_s22 = smov [#allocation8]   ;;  %s2415_s1 = smov 16  }
  0x10   :  { %s87_s23 = sshll.u32 %s2414_s22, 4  ;;  %s2416_s24 = smov 1   ;;  %s88_s23 = int_to_ptr.vmem [resolvable:$true] %s87_s23 }
  0x11   :  { %93 = dma.hbm_to_vmem [thread:$0]  %s86_s4, 32, %s88_s23, [#allocation9], %s2415_s1, %s2415_s1, %s2416_s24  }
  0x12   :  { %s49_s27 = sshll.u32 %s3197_s26, 4  ;;  %s113_s9 = sshll.u32 %s3177_s12, 4  ;;  %s50_s27 = int_to_ptr.hbm [resolvable:$true] %s49_s27  ;;  %s114_s9 = int_to_ptr.hbm [resolvable:$true] %s113_s9 }
  0x13   :  { %57 = dma.hbm_to_vmem [thread:$0]  %s50_s27, 512, %s52_s28, [#allocation6], %s3190_s30, %s3190_s30, %s2413_s5  }
  0x14   :  { %s2417_s26 = smov [#allocation11]   ;;  %s141_s28 = sshll.u32 %s3180_s15, 4  ;;  %s142_s28 = int_to_ptr.hbm [resolvable:$true] %s141_s28 }
  0x15   :  { %s115_s3 = sshll.u32 %s2417_s26, 4  ;;  %s2418_s0 = smov [#allocation14]   ;;  %s116_s3 = int_to_ptr.vmem [resolvable:$true] %s115_s3 }
  0x16   :  { %121 = dma.hbm_to_vmem [thread:$0]  %s114_s9, 32, %s116_s3, [#allocation12], %s2415_s1, %s2415_s1, %s2416_s24  }
  0x17   :  { %s143_s22 = sshll.u32 %s2418_s0, 4  ;;  %s3198_s30 = sld [smem:[#allocation24_spill]]  ;;  %s144_s22 = int_to_ptr.vmem [resolvable:$true] %s143_s22 }
  0x18   :  { %149 = dma.hbm_to_vmem [thread:$0]  %s142_s28, 32, %s144_s22, [#allocation15], %s2415_s1, %s2415_s1, %s2416_s24  }
  0x19   :  { %s3199_s15 = sld [smem:[#allocation28_spill]]  ;;  %s2419_s29 = smov [#allocation2]  }
  0x1a   :  { %s38_s27 = sshll.u32 %s2419_s29, 4  ;;  %s3200_s9 = smov 128   ;;  %s39_s27 = int_to_ptr.vmem [resolvable:$true] %s38_s27 }
  0x1b   :  { %s2420_s3 = smov [#allocation7]   ;;  %s98_s23 = sshll.u32 %s3175_s10, 4  ;;  %s99_s23 = int_to_ptr.hbm [resolvable:$true] %s98_s23 }
  0x1c   :  { %s128_s12 = sshll.u32 %s3179_s14, 4  ;;  %s2421_s25 = smov [#allocation10]   ;;  %s129_s12 = int_to_ptr.hbm [resolvable:$true] %s128_s12 }
  0x1d   :  { %s36_s2 = sshll.u32 %s3198_s30, 4  ;;  %s69_s30 = sshll.u32 %s2420_s3, 4  ;;  %s37_s2 = int_to_ptr.hbm [resolvable:$true] %s36_s2  ;;  %s70_s30 = int_to_ptr.vmem [resolvable:$true] %s69_s30 }
  0x1e   :  { %44 = dma.hbm_to_vmem [thread:$0]  %s37_s2, 512, %s39_s27, [#allocation3], %s3200_s9, %s3200_s9, %s2413_s5  }
  0x1f   :  { %s67_s26 = sshll.u32 %s3199_s15, 4  ;;  %s100_s15 = sshll.u32 %s2421_s25, 4  ;;  %s68_s26 = int_to_ptr.hbm [resolvable:$true] %s67_s26  ;;  %s101_s15 = int_to_ptr.vmem [resolvable:$true] %s100_s15 }
  0x20   :  { %72 = dma.hbm_to_vmem [thread:$0]  %s68_s26, 128, %s70_s30, [#allocation6]  }
  0x21   :  { %106 = dma.hbm_to_vmem [thread:$0]  %s99_s23, 32, %s101_s15, [#allocation9], %s2415_s1, %s2415_s1, %s2416_s24  }
  0x22   :  { %s2422_s5 = smov [#allocation13]   ;;  %s159_s10 = sshll.u32 %s3183_s18, 4  ;;  %s160_s10 = int_to_ptr.hbm [resolvable:$true] %s159_s10 }
  0x23   :  { %s130_s2 = sshll.u32 %s2422_s5, 4  ;;  %s2423_s14 = smov [#allocation16]   ;;  %s131_s2 = int_to_ptr.vmem [resolvable:$true] %s130_s2 }
  0x24   :  { %136 = dma.hbm_to_vmem [thread:$0]  %s129_s12, 32, %s131_s2, [#allocation12], %s2415_s1, %s2415_s1, %s2416_s24  }
  0x25   :  { %s161_s26 = sshll.u32 %s2423_s14, 4  ;;  %s162_s26 = int_to_ptr.vmem [resolvable:$true] %s161_s26 }
  0x26   :  { %164 = dma.hbm_to_vmem [thread:$0]  %s160_s10, 16, %s162_s26, [#allocation15]  }
  0x27   :  { %2399 = dma.done.wait [#allocation3], 512  }
  0x28   :  { %2400 = vsyncadd [#allocation3], 4294966784 }
  0x29   :  { %2401 = dma.done.wait [#allocation6], 640  }
  0x2a   :  { %2402 = vsyncadd [#allocation6], 4294966656 }
  0x2b   :  { %2403 = dma.done.wait [#allocation9], 64  }
  0x2c   :  { %2404 = vsyncadd [#allocation9], 4294967232 }
  0x2d   :  { %2405 = dma.done.wait [#allocation12], 64  }
  0x2e   :  { %2406 = vsyncadd [#allocation12], 4294967232 }
  0x2f   :  { %2407 = dma.done.wait [#allocation15], 48  }
  0x30   :  { %2408 = vsyncadd [#allocation15], 4294967248  ;;  %v217_v0 = vld [vmem:[#allocation5 + $0x18] sm:$0xff]  ;;  %v216_v1 = vld [vmem:[#allocation5 + $0x10] sm:$0xff]  ;;  %s3201_s24 = sld [smem:[#allocation29_spill]]  ;;  %vm218_vm0 = vcmask 261120  }
  0x31   :  { %243 = vmatpush.msra.mxu0 %v217_v0  ;;  %v215_v2 = vld [vmem:[#allocation5 + $0x8] sm:$0xff]  ;;  %v214_v3 = vld [vmem:[#allocation5] sm:$0xff]  ;;  %v212_v8 = vld [vmem:[#allocation2 + $0x10] sm:$0xff]  ;;  %s3202_s12 = sld [smem:[#allocation26_spill]]  ;;  %s2424_s29 = smov 64   ;;  %vm403_vm1 = vcmask 64512  }
  0x32   :  { %v210_v5 = vld [vmem:[#allocation2] sm:$0xff]  ;;  %v211_v7 = vld [vmem:[#allocation2 + $0x8] sm:$0xff]  ;;  %v213_v9 = vld [vmem:[#allocation2 + $0x18] sm:$0xff]  ;;  %s2425_s27 = smov 96   ;;  %s3203_s26 = sld [smem:[#allocation27_spill]] }
  0x33   :  { %244 = vmatpush.msra.mxu0 %v216_v1  ;;  %v2054_v22 = vld [vmem:[%s3171_s6] ss:$0 sm:$0xff]  ;;  %s2428_s25 = smov [#allocation17]   ;;  %s1925_s5 = sshll.u32 %s3186_s21, 4  ;;  %s1926_s5 = int_to_ptr.hbm [resolvable:$true] %s1925_s5 }
  0x34   :  { %v2672_v54 = vld [vmem:[#allocation7] sm:$0xff] }
  0x35   :  { %245 = vmatpush.msra.mxu0 %v215_v2  ;;  %2035 = vmatpush.msra.mxu3 %v2672_v54 }
  0x36   :  { %v269_v4 = vld [vmem:[%s3201_s24 + $0x18] sm:$0xff]  ;;  %v268_v6 = vld [vmem:[%s3201_s24 + $0x10] sm:$0xff]  ;;  %v267_v10 = vld [vmem:[%s3201_s24 + $0x8] sm:$0xff] }
  0x37   :  { %321 = vmatpush.msra.mxu1 %v269_v4  ;;  %2031 = vmatpush.msra.mxu2 %v269_v4  ;;  %v266_v11 = vld [vmem:[%s3201_s24] sm:$0xff]  ;;  %v261_v15 = vld [vmem:[%s3202_s12 + $0x8] sm:$0xff] }
  0x38   :  { %246 = vmatpush.msra.mxu0 %v214_v3  ;;  %v260_v12 = vld [vmem:[%s3202_s12] sm:$0xff]  ;;  %v2639_v31 = vld [vmem:[%s3203_s26 + $0x18] sm:$0xff]  ;;  %v2644_v32 = vld [vmem:[%s3203_s26 + $0x10] sm:$0xff] }
  0x39   :  { %322 = vmatpush.msra.mxu1 %v268_v6  ;;  %2032 = vmatpush.msra.mxu2 %v268_v6  ;;  %v2651_v33 = vld [vmem:[%s3203_s26 + $0x8] sm:$0xff]  ;;  %v2657_v34 = vld [vmem:[%s3203_s26] sm:$0xff] }
  0x3a   :  { %1939 = vmatmul.msk.f32.vlgmr.msra.gmra.mxu0 %vm218_vm0, %v210_v5  ;;  %551 = vmatpush.msrb.mxu3 %v2639_v31 }
  0x3b   :  { %323 = vmatpush.msra.mxu1 %v267_v10  ;;  %2033 = vmatpush.msra.mxu2 %v267_v10 }
  0x3c   :  { %651 = vmatpush.msrb.mxu0 %v2672_v54  ;;  %552 = vmatpush.msrb.mxu3 %v2644_v32 }
  0x3d   :  { %324 = vmatpush.msra.mxu1 %v266_v11  ;;  %2034 = vmatpush.msra.mxu2 %v266_v11 }
  0x3e   :  { %553 = vmatpush.msrb.mxu3 %v2651_v33 }
  0x3f   :  { %386 = vmatpush.msrb.mxu2 %v2639_v31  ;;  %487 = vmatpush.msrb.mxu1 %v2672_v54 }
  0x40   :  { %554 = vmatpush.msrb.mxu3 %v2657_v34 }
  0x41   :  { %387 = vmatpush.msrb.mxu2 %v2644_v32 }
  0x42   :  { %1940 = vmatmul.msk.f32.gmra.mxu0 %vm218_vm0, %v211_v7 }
  0x43   :  { %388 = vmatpush.msrb.mxu2 %v2651_v33 }
  0x45   :  { %389 = vmatpush.msrb.mxu2 %v2657_v34 }
  0x4a   :  { %1941 = vmatmul.msk.f32.gmra.mxu0 %vm218_vm0, %v212_v8 }
  0x52   :  { %1942 = vmatmul.msk.f32.gmra.mxu0 %vm218_vm0, %v213_v9 }
  0xb7   :  { %v248_v13 = vpop.f32.mrf.mxu0 }
  0xb8   :  { %v2606_v14 = vadd.f32 %v260_v12, %v248_v13 }
  0xba   :  { %1943 = vmatmul.msk.f32.vlgmr.msra.gmra.mxu1 %vm218_vm0, %v2606_v14 }
  0xbf   :  { %v251_v16 = vpop.f32.mrf.mxu0 }
  0xc0   :  { %v2613_v17 = vadd.f32 %v261_v15, %v251_v16 }
  0xc2   :  { %1944 = vmatmul.msk.f32.gmra.mxu1 %vm218_vm0, %v2613_v17 }
  0xc7   :  { %v254_v18 = vpop.f32.mrf.mxu0 }
  0xc8   :  { %v2617_v19 = vadd.f32 %v260_v12, %v254_v18 }
  0xca   :  { %1945 = vmatmul.msk.f32.gmra.mxu1 %vm218_vm0, %v2617_v19 }
  0xcf   :  { %v257_v20 = vpop.f32.mrf.mxu0 }
  0xd0   :  { %v2621_v21 = vadd.f32 %v261_v15, %v257_v20 }
  0xd2   :  { %1946 = vmatmul.msk.f32.vlgmr.msra.gmra.mxu2 %vm218_vm0, %v2621_v21 }
 0x137   :  { %v326_v23 = vpop.f32.mrf.mxu1 }
 0x138   :  { %v327_v24 = vadd.f32 %v2054_v22, %v326_v23 }
 0x13a   :  { %501 = vrot.lane.b32.xlu2 %v327_v24, %s2424_s29  ;;  %346 = vrot.lane.b32.xlu0 %v327_v24, %s2425_s27  ;;  %v338_v35 = vmul.f32 0.5, %v327_v24 }
 0x13f   :  { %v329_v25 = vpop.f32.mrf.mxu1 }
 0x140   :  { %v330_v26 = vadd.f32 %v2054_v22, %v329_v25 }
 0x142   :  { %348 = vrot.lane.b32.xlu0 %v330_v26, %s2425_s27  ;;  %v339_v40 = vmul.f32 0.5, %v330_v26 }
 0x147   :  { %v332_v27 = vpop.f32.mrf.mxu1 }
 0x148   :  { %v333_v28 = vadd.f32 %v2054_v22, %v332_v27 }
 0x14a   :  { %503 = vrot.lane.b32.xlu0 %v330_v26, %s2424_s29  ;;  %505 = vrot.lane.b32.xlu2 %v333_v28, %s2424_s29  ;;  %v340_v36 = vmul.f32 0.5, %v333_v28 }
 0x14b   :  { %350 = vrot.lane.b32.xlu1 %v333_v28, %s2425_s27 }
 0x155   :  { %v335_v29 = vpop.f32.mrf.mxu2 }
 0x156   :  { %v336_v30 = vadd.f32 %v2054_v22, %v335_v29 }
 0x158   :  { %352 = vrot.lane.b32.xlu1 %v336_v30, %s2425_s27  ;;  %v341_v41 = vmul.f32 0.5, %v336_v30 }
 0x160   :  { %507 = vrot.lane.b32.xlu1 %v336_v30, %s2424_s29 }
 0x1ac   :  { %v347_v37 = vpop.permute.xlu0 %346 }
 0x1ad   :  { %v358_v38 = vmul.f32 %v347_v37, %v338_v35  ;;  %v2660_v39 = vmul.f32 %v347_v37, %v340_v36 }
 0x1af   :  { %1947 = vmatmul.msk.f32.vlgmr.msrb.gmra.mxu2 %vm218_vm0, %v358_v38 }
 0x1b4   :  { %v349_v42 = vpop.permute.xlu0 %348 }
 0x1b5   :  { %v359_v43 = vmul.f32 %v349_v42, %v339_v40  ;;  %v2663_v44 = vmul.f32 %v349_v42, %v341_v41 }
 0x1b7   :  { %1948 = vmatmul.msk.f32.gmra.mxu2 %vm218_vm0, %v359_v43 }
 0x1bd   :  { %v351_v45 = vpop.permute.xlu1 %350 }
 0x1be   :  { %v360_v46 = vmul.f32 %v351_v45, %v338_v35  ;;  %v2666_v47 = vmul.f32 %v351_v45, %v340_v36 }
 0x1c0   :  { %1949 = vmatmul.msk.f32.gmra.mxu2 %vm218_vm0, %v360_v46 }
 0x1ca   :  { %v353_v48 = vpop.permute.xlu1 %352 }
 0x1cb   :  { %v361_v49 = vmul.f32 %v353_v48, %v339_v40  ;;  %v2669_v50 = vmul.f32 %v353_v48, %v341_v41 }
 0x1cd   :  { %1950 = vmatmul.msk.f32.gmra.mxu2 %vm218_vm0, %v361_v49 }
 0x232   :  { %v391_v51 = vpop.f32.mrf.mxu2 }
 0x233   :  { %v404_v55 = vsel %vm403_vm1, %v391_v51, -inf }
 0x23a   :  { %v394_v52 = vpop.f32.mrf.mxu2 }
 0x23b   :  { %v407_v0 = vsel %vm403_vm1, %v394_v52, -inf }
 0x243   :  { %v397_v53 = vpop.f32.mrf.mxu2 }
 0x244   :  { %v405_v56 = vsel %vm403_vm1, %v397_v53, -inf }
 0x245   :  { %v406_v57 = vmax.f32 %v404_v55, %v405_v56 }
 0x247   :  { %v410_v58 = vsub.f32 %v391_v51, %v406_v57  ;;  %v412_v59 = vsub.f32 %v397_v53, %v406_v57  ;;  %v273_v53 = vld [vmem:[%s3172_s7 + $0x10] sm:$0xff] }
 0x249   :  { %v414_v60 = vmul.f32 1.442695, %v410_v58  ;;  %v418_v61 = vmul.f32 1.442695, %v412_v59 }
 0x24b   :  { %2073 = vpow2.f32 %v414_v60 }
 0x24c   :  { %2075 = vpow2.f32 %v418_v61 }
 0x250   :  { %v400_v62 = vpop.f32.mrf.mxu2 }
 0x251   :  { %v2074_v63 = vpop.eup %2073  ;;  %v408_v1 = vsel %vm403_vm1, %v400_v62, -inf }
 0x252   :  { %v2076_v2 = vpop.eup %2075  ;;  %v422_v3 = vsel %vm403_vm1, %v2074_v63, 0.0  ;;  %v409_v4 = vmax.f32 %v407_v0, %v408_v1  ;;  %v2729_v1 = vpop.permute.xlu1 %507 }
 0x253   :  { %v423_v5 = vsel %vm403_vm1, %v2076_v2, 0.0 }
 0x254   :  { %v424_v6 = vadd.f32 %v423_v5, %v422_v3  ;;  %v411_v7 = vsub.f32 %v394_v52, %v409_v4  ;;  %v413_v8 = vsub.f32 %v400_v62, %v409_v4  ;;  %v274_v52 = vld [vmem:[%s3172_s7 + $0x18] sm:$0xff] }
 0x255   :  { %702 = vmatpush.msra.mxu1 %v274_v52 }
 0x256   :  { %2077 = vrcp.f32 %v424_v6  ;;  %v416_v9 = vmul.f32 1.442695, %v411_v7  ;;  %v420_v10 = vmul.f32 1.442695, %v413_v8  ;;  %v439_v22 = vand.u32 2147483648, %v424_v6 }
 0x257   :  { %v437_v25 = vand.u32 2147483647, %v424_v6  ;;  %vm433_vm3 = vweird.f32 %v424_v6  ;;  %703 = vmatpush.msra.mxu1 %v273_v53 }
 0x258   :  { %2079 = vpow2.f32 %v416_v9  ;;  %v440_v27 = vor.u32 1.1754944e-38, %v439_v22 }
 0x259   :  { %2081 = vpow2.f32 %v420_v10  ;;  %vm438_vm5 = vcmp.eq.f32.partialorder %v437_v25, 8.507059e+37 }
 0x25c   :  { %v2078_v11 = vpop.eup %2077 }
 0x25d   :  { %v429_v12 = vmul.f32 %v2078_v11, %v424_v6  ;;  %vm434_vm2 = vweird.f32 %v2078_v11 }
 0x25e   :  { %v2080_v13 = vpop.eup %2079  ;;  %vm435_vm4 = vmor %vm433_vm3, %vm434_vm2 }
 0x25f   :  { %v2082_v15 = vpop.eup %2081  ;;  %v425_v16 = vsel %vm403_vm1, %v2080_v13, 0.0  ;;  %v430_v18 = vsub.f32 1.0, %v429_v12 }
 0x260   :  { %v426_v20 = vsel %vm403_vm1, %v2082_v15, 0.0 }
 0x261   :  { %v427_v23 = vadd.f32 %v426_v20, %v425_v16  ;;  %v431_v24 = vmul.f32 %v2078_v11, %v430_v18 }
 0x263   :  { %2083 = vrcp.f32 %v427_v23  ;;  %v432_v26 = vadd.f32 %v2078_v11, %v431_v24  ;;  %v454_v40 = vand.u32 2147483648, %v427_v23  ;;  %v452_v42 = vand.u32 2147483647, %v427_v23 }
 0x264   :  { %vm448_vm7 = vweird.f32 %v427_v23 }
 0x265   :  { %v436_v28 = vsel %vm435_vm4, %v2078_v11, %v432_v26  ;;  %v455_v45 = vor.u32 1.1754944e-38, %v454_v40  ;;  %vm453_vm9 = vcmp.eq.f32.partialorder %v452_v42, 8.507059e+37 }
 0x266   :  { %v441_v29 = vsel %vm438_vm5, %v440_v27, %v436_v28 }
 0x267   :  { %v442_v30 = vmul.f32 %v2074_v63, %v441_v29  ;;  %v458_v35 = vmul.f32 %v2076_v2, %v441_v29  ;;  %v2726_v63 = vpop.permute.xlu0 %503 }
 0x269   :  { %v2084_v36 = vpop.eup %2083  ;;  %1951 = vmatmul.msk.f32.vlgmr.msrb.gmra.mxu1 %vm403_vm1, %v442_v30  ;;  %1953 = vmatmul.msk.f32.vlgmr.msra.gmra.mxu3 %vm403_vm1, %v458_v35 }
 0x26a   :  { %v444_v37 = vmul.f32 %v2084_v36, %v427_v23  ;;  %vm449_vm6 = vweird.f32 %v2084_v36 }
 0x26b   :  { %vm450_vm8 = vmor %vm448_vm7, %vm449_vm6 }
 0x26c   :  { %v445_v38 = vsub.f32 1.0, %v444_v37 }
 0x26e   :  { %v446_v41 = vmul.f32 %v2084_v36, %v445_v38 }
 0x270   :  { %v447_v43 = vadd.f32 %v2084_v36, %v446_v41 }
 0x272   :  { %v451_v46 = vsel %vm450_vm8, %v2084_v36, %v447_v43 }
 0x273   :  { %v456_v48 = vsel %vm453_vm9, %v455_v45, %v451_v46 }
 0x274   :  { %v457_v49 = vmul.f32 %v2080_v13, %v456_v48  ;;  %v459_v51 = vmul.f32 %v2082_v15, %v456_v48 }
 0x276   :  { %1952 = vmatmul.msk.f32.gmra.mxu1 %vm403_vm1, %v457_v49  ;;  %1954 = vmatmul.msk.f32.gmra.mxu3 %vm403_vm1, %v459_v51 }
 0x27e   :  { %1955 = vmatmul.msk.f32.vlgmr.msrb.gmra.mxu3 %vm218_vm0, %v2660_v39  ;;  %v272_v39 = vld [vmem:[%s3172_s7 + $0x8] sm:$0xff] }
 0x27f   :  { %704 = vmatpush.msra.mxu1 %v272_v39 }
 0x286   :  { %1956 = vmatmul.msk.f32.gmra.mxu3 %vm218_vm0, %v2663_v44  ;;  %v271_v44 = vld [vmem:[%s3172_s7] sm:$0xff] }
 0x287   :  { %705 = vmatpush.msra.mxu1 %v271_v44 }
 0x289   :  { %1163 = vmatpush.msrb.mxu1 %v2639_v31 }
 0x28b   :  { %1164 = vmatpush.msrb.mxu1 %v2644_v32 }
 0x28d   :  { %1165 = vmatpush.msrb.mxu1 %v2651_v33 }
 0x28e   :  { %1957 = vmatmul.msk.f32.gmra.mxu3 %vm218_vm0, %v2666_v47  ;;  %v2717_v47 = vpop.permute.xlu2 %501 }
 0x28f   :  { %1166 = vmatpush.msrb.mxu1 %v2657_v34 }
 0x296   :  { %1958 = vmatmul.msk.f32.gmra.mxu3 %vm218_vm0, %v2669_v50  ;;  %v2720_v56 = vpop.permute.xlu2 %505 }
 0x2e6   :  { %v489_v50 = vpop.f32.mrf.mxu1 }
 0x2e7   :  { %v513_v55 = vmul.f32 %v2717_v47, %v489_v50 }
 0x2e9   :  { %v517_v59 = vsel %vm218_vm0, %v513_v55, 0.0 }
 0x2ec   :  { %v495_v57 = vpop.f32.mrf.mxu3 }
 0x2ed   :  { %v515_v58 = vmul.f32 %v2720_v56, %v495_v57 }
 0x2ef   :  { %v518_v60 = vsel %vm218_vm0, %v515_v58, 0.0 }
 0x2f0   :  { %v519_v61 = vadd.f32 %v518_v60, %v517_v59 }
 0x2f2   :  { %1963 = vmatmul.msk.f32.vlgmr.msra.gmra.mxu1 %vm218_vm0, %v519_v61 }
 0x2f3   :  { %v492_v62 = vpop.f32.mrf.mxu1 }
 0x2f4   :  { %v514_v0 = vmul.f32 %v2726_v63, %v492_v62 }
 0x2f6   :  { %v520_v4 = vsel %vm218_vm0, %v514_v0, 0.0 }
 0x2f9   :  { %v498_v2 = vpop.f32.mrf.mxu3 }
 0x2fa   :  { %v516_v3 = vmul.f32 %v2729_v1, %v498_v2 }
 0x2fc   :  { %v521_v5 = vsel %vm218_vm0, %v516_v3, 0.0 }
 0x2fd   :  { %v522_v6 = vadd.f32 %v521_v5, %v520_v4 }
 0x2ff   :  { %1964 = vmatmul.msk.f32.gmra.mxu1 %vm218_vm0, %v522_v6 }
 0x301   :  { %v556_v7 = vpop.f32.mrf.mxu3 }
 0x302   :  { %v568_v10 = vsel %vm403_vm1, %v556_v7, -inf }
 0x309   :  { %v559_v8 = vpop.f32.mrf.mxu3 }
 0x30a   :  { %v571_v22 = vsel %vm403_vm1, %v559_v8, -inf }
 0x311   :  { %v562_v9 = vpop.f32.mrf.mxu3 }
 0x312   :  { %v569_v11 = vsel %vm403_vm1, %v562_v9, -inf }
 0x313   :  { %v570_v12 = vmax.f32 %v568_v10, %v569_v11 }
 0x315   :  { %v574_v13 = vsub.f32 %v556_v7, %v570_v12  ;;  %v576_v15 = vsub.f32 %v562_v9, %v570_v12 }
 0x317   :  { %v578_v16 = vmul.f32 1.442695, %v574_v13  ;;  %v582_v18 = vmul.f32 1.442695, %v576_v15 }
 0x319   :  { %2085 = vpow2.f32 %v578_v16  ;;  %v565_v20 = vpop.f32.mrf.mxu3 }
 0x31a   :  { %2087 = vpow2.f32 %v582_v18  ;;  %v572_v23 = vsel %vm403_vm1, %v565_v20, -inf }
 0x31b   :  { %v573_v24 = vmax.f32 %v571_v22, %v572_v23 }
 0x31d   :  { %v575_v25 = vsub.f32 %v559_v8, %v573_v24  ;;  %v577_v26 = vsub.f32 %v565_v20, %v573_v24  ;;  %v2055_v8 = vld [vmem:[%s3173_s8] ss:$0 sm:$0xff] }
 0x31f   :  { %v2086_v27 = vpop.eup %2085  ;;  %v580_v28 = vmul.f32 1.442695, %v575_v25  ;;  %v584_v29 = vmul.f32 1.442695, %v577_v26 }
 0x320   :  { %v2088_v30 = vpop.eup %2087  ;;  %v586_v35 = vsel %vm403_vm1, %v2086_v27, 0.0 }
 0x321   :  { %v587_v36 = vsel %vm403_vm1, %v2088_v30, 0.0  ;;  %2089 = vpow2.f32 %v580_v28 }
 0x322   :  { %v588_v37 = vadd.f32 %v587_v36, %v586_v35  ;;  %2091 = vpow2.f32 %v584_v29 }
 0x324   :  { %2093 = vrcp.f32 %v588_v37  ;;  %v603_v49 = vand.u32 2147483648, %v588_v37  ;;  %v601_v52 = vand.u32 2147483647, %v588_v37  ;;  %vm597_vm11 = vweird.f32 %v588_v37 }
 0x326   :  { %v604_v44 = vor.u32 1.1754944e-38, %v603_v49  ;;  %vm602_vm13 = vcmp.eq.f32.partialorder %v601_v52, 8.507059e+37 }
 0x327   :  { %v2090_v38 = vpop.eup %2089 }
 0x328   :  { %v2092_v40 = vpop.eup %2091  ;;  %v589_v41 = vsel %vm403_vm1, %v2090_v38, 0.0 }
 0x329   :  { %v590_v42 = vsel %vm403_vm1, %v2092_v40, 0.0 }
 0x32a   :  { %v2094_v43 = vpop.eup %2093  ;;  %v591_v45 = vadd.f32 %v590_v42, %v589_v41 }
 0x32b   :  { %v593_v46 = vmul.f32 %v2094_v43, %v588_v37  ;;  %vm598_vm10 = vweird.f32 %v2094_v43 }
 0x32c   :  { %2095 = vrcp.f32 %v591_v45  ;;  %vm599_vm12 = vmor %vm597_vm11, %vm598_vm10  ;;  %v618_v60 = vand.u32 2147483648, %v591_v45  ;;  %v616_v62 = vand.u32 2147483647, %v591_v45  ;;  %vm612_vm15 = vweird.f32 %v591_v45 }
 0x32d   :  { %v594_v48 = vsub.f32 1.0, %v593_v46 }
 0x32e   :  { %v619_v2 = vor.u32 1.1754944e-38, %v618_v60  ;;  %vm617_vm3 = vcmp.eq.f32.partialorder %v616_v62, 8.507059e+37 }
 0x32f   :  { %v595_v51 = vmul.f32 %v2094_v43, %v594_v48 }
 0x331   :  { %v596_v53 = vadd.f32 %v2094_v43, %v595_v51 }
 0x332   :  { %v2096_v39 = vpop.eup %2095 }
 0x333   :  { %v600_v50 = vsel %vm599_vm12, %v2094_v43, %v596_v53  ;;  %v608_v55 = vmul.f32 %v2096_v39, %v591_v45  ;;  %vm613_vm14 = vweird.f32 %v2096_v39 }
 0x334   :  { %v605_v57 = vsel %vm602_vm13, %v604_v44, %v600_v50  ;;  %vm614_vm2 = vmor %vm612_vm15, %vm613_vm14 }
 0x335   :  { %v606_v58 = vmul.f32 %v2086_v27, %v605_v57  ;;  %v609_v59 = vsub.f32 1.0, %v608_v55  ;;  %v622_v6 = vmul.f32 %v2088_v30, %v605_v57 }
 0x337   :  { %1959 = vmatmul.msk.f32.vlgmr.msrb.gmra.mxu0 %vm403_vm1, %v606_v58  ;;  %v610_v61 = vmul.f32 %v2096_v39, %v609_v59 }
 0x339   :  { %v611_v0 = vadd.f32 %v2096_v39, %v610_v61 }
 0x33b   :  { %v615_v3 = vsel %vm614_vm2, %v2096_v39, %v611_v0 }
 0x33c   :  { %v620_v4 = vsel %vm617_vm3, %v619_v2, %v615_v3  ;;  %vm883_vm3 = vcmask 523264  }
 0x33d   :  { %v621_v5 = vmul.f32 %v2090_v38, %v620_v4  ;;  %v623_v7 = vmul.f32 %v2092_v40, %v620_v4 }
 0x33f   :  { %1960 = vmatmul.msk.f32.gmra.mxu0 %vm403_vm1, %v621_v5 }
 0x347   :  { %1961 = vmatmul.msk.f32.gmra.mxu0 %vm403_vm1, %v622_v6 }
 0x34f   :  { %1962 = vmatmul.msk.f32.gmra.mxu0 %vm403_vm1, %v623_v7  ;;  %v280_v7 = vld [vmem:[%s3176_s11 + $0x10] sm:$0xff] }
 0x36f   :  { %v707_v9 = vpop.f32.mrf.mxu1 }
 0x370   :  { %v708_v10 = vadd.f32 %v2055_v8, %v707_v9  ;;  %v279_v9 = vld [vmem:[%s3176_s11 + $0x8] sm:$0xff] }
 0x372   :  { %v719_v11 = vadd.f32 %v708_v10, %v2606_v14  ;;  %v278_v10 = vld [vmem:[%s3176_s11] sm:$0xff] }
 0x374   :  { %v723_v12 = vsel %vm218_vm0, %v719_v11, 0.0 }
 0x375   :  { %724 = vadd.xlane.f32.xlu2 %v723_v12 }
 0x37c   :  { %v710_v13 = vpop.f32.mrf.mxu1 }
 0x37d   :  { %v711_v15 = vadd.f32 %v2055_v8, %v710_v13 }
 0x37f   :  { %v720_v16 = vadd.f32 %v711_v15, %v2613_v17 }
 0x381   :  { %v726_v18 = vsel %vm218_vm0, %v720_v16, 0.0 }
 0x382   :  { %727 = vadd.xlane.f32.xlu0 %v726_v18 }
 0x3b4   :  { %v653_v20 = vpop.f32.mrf.mxu0 }
 0x3b5   :  { %v665_v23 = vmul.f32 %v653_v20, %v2717_v47 }
 0x3b7   :  { %v669_v26 = vsel %vm218_vm0, %v665_v23, 0.0 }
 0x3bc   :  { %v656_v22 = vpop.f32.mrf.mxu0 }
 0x3bd   :  { %v666_v28 = vmul.f32 %v656_v22, %v2726_v63 }
 0x3bf   :  { %v672_v30 = vsel %vm218_vm0, %v666_v28, 0.0 }
 0x3c4   :  { %v659_v24 = vpop.f32.mrf.mxu0 }
 0x3c5   :  { %v667_v25 = vmul.f32 %v659_v24, %v2720_v56  ;;  %v2426_v56 = vmov 32.0  }
 0x3c6   :  { %2097 = vrcp.f32 %v2426_v56 }
 0x3c7   :  { %v670_v14 = vsel %vm218_vm0, %v667_v25, 0.0 }
 0x3c8   :  { %v671_v27 = vadd.f32 %v670_v14, %v669_v26 }
 0x3ca   :  { %1965 = vmatmul.msk.f32.gmra.mxu1 %vm218_vm0, %v671_v27 }
 0x3cc   :  { %v662_v17 = vpop.f32.mrf.mxu0  ;;  %v2098_v36 = vpop.eup %2097 }
 0x3cd   :  { %v668_v29 = vmul.f32 %v662_v17, %v2729_v1  ;;  %v736_v37 = vmul.f32 32.0, %v2098_v36  ;;  %vm740_vm4 = vweird.f32 %v2098_v36 }
 0x3cf   :  { %v673_v35 = vsel %vm218_vm0, %v668_v29, 0.0  ;;  %v737_v38 = vsub.f32 1.0, %v736_v37 }
 0x3d0   :  { %v674_v47 = vadd.f32 %v673_v35, %v672_v30 }
 0x3d1   :  { %v738_v40 = vmul.f32 %v2098_v36, %v737_v38  ;;  %v2057_v38 = vld [vmem:[#allocation10] ss:$0 sm:$0xff] }
 0x3d2   :  { %1966 = vmatmul.msk.f32.gmra.mxu1 %vm218_vm0, %v674_v47  ;;  %v2805_v47 = vld [vmem:[#allocation8] ss:$0 sm:$0xff] }
 0x3d3   :  { %v739_v41 = vadd.f32 %v2098_v36, %v738_v40 }
 0x3d5   :  { %v2764_v42 = vsel %vm740_vm4, %v2098_v36, %v739_v41 }
 0x3e8   :  { %v725_v53 = vpop.xlane.xlu2 %724 }
 0x3e9   :  { %v742_v44 = vmul.f32 %v2764_v42, %v725_v53 }
 0x3eb   :  { %v746_v57 = vsub.f32 %v719_v11, %v742_v44 }
 0x3ed   :  { %v750_v59 = vmul.f32 %v746_v57, %v746_v57 }
 0x3ef   :  { %v754_v60 = vsel %vm218_vm0, %v750_v59, 0.0 }
 0x3f5   :  { %v728_v63 = vpop.xlane.xlu0 %727 }
 0x3f6   :  { %v743_v1 = vmul.f32 %v2764_v42, %v728_v63 }
 0x3f8   :  { %v2767_v43 = vsub.f32 %v720_v16, %v743_v1 }
 0x3fa   :  { %v751_v45 = vmul.f32 %v2767_v43, %v2767_v43 }
 0x3fc   :  { %v757_v46 = vsel %vm218_vm0, %v751_v45, 0.0 }
 0x3fd   :  { %758 = vadd.xlane.f32.xlu0 %v757_v46 }
 0x447   :  { %v713_v48 = vpop.f32.mrf.mxu1 }
 0x448   :  { %v714_v49 = vadd.f32 %v2055_v8, %v713_v48 }
 0x44a   :  { %v721_v51 = vadd.f32 %v714_v49, %v2617_v19  ;;  %v290_v49 = vld [vmem:[%s3178_s13 + $0x38] sm:$0xff] }
 0x44b   :  { %904 = vmatpush.msra.mxu3 %v290_v49 }
 0x44c   :  { %v729_v52 = vsel %vm218_vm0, %v721_v51, 0.0 }
 0x44d   :  { %730 = vadd.xlane.f32.xlu1 %v729_v52 }
 0x44f   :  { %v716_v39 = vpop.f32.mrf.mxu1 }
 0x450   :  { %v717_v50 = vadd.f32 %v2055_v8, %v716_v39  ;;  %v287_v39 = vld [vmem:[%s3178_s13 + $0x20] sm:$0xff] }
 0x452   :  { %v722_v55 = vadd.f32 %v717_v50, %v2621_v21  ;;  %v281_v21 = vld [vmem:[%s3176_s11 + $0x18] sm:$0xff] }
 0x453   :  { %859 = vmatpush.msra.mxu2 %v281_v21 }
 0x454   :  { %v732_v58 = vsel %vm218_vm0, %v722_v55, 0.0 }
 0x455   :  { %733 = vadd.xlane.f32.xlu2 %v732_v58  ;;  %860 = vmatpush.msra.mxu2 %v280_v7  ;;  %v283_v7 = vld [vmem:[%s3178_s13] sm:$0xff] }
 0x457   :  { %861 = vmatpush.msra.mxu2 %v279_v9 }
 0x459   :  { %862 = vmatpush.msra.mxu2 %v278_v10 }
 0x45b   :  { %1263 = vmatpush.msrb.mxu2 %v2672_v54 }
 0x45d   :  { %755 = vadd.xlane.f32.xlu2 %v754_v60 }
 0x470   :  { %v759_v61 = vpop.xlane.xlu0 %758 }
 0x471   :  { %v767_v0 = vmul.f32 %v759_v61, %v2764_v42 }
 0x473   :  { %v771_v4 = vadd.f32 1e-05, %v767_v0  ;;  %v285_v0 = vld [vmem:[%s3178_s13 + $0x10] sm:$0xff] }
 0x475   :  { %2099 = vrsqrt.f32 %v771_v4  ;;  %vm790_vm9 = vweird.f32 %v771_v4 }
 0x47b   :  { %v2100_v16 = vpop.eup %2099 }
 0x47c   :  { %v785_v22 = vmul.f32 %v2100_v16, %v771_v4  ;;  %vm791_vm6 = vweird.f32 %v2100_v16 }
 0x47d   :  { %vm792_vm10 = vmor %vm790_vm9, %vm791_vm6 }
 0x47e   :  { %v786_v23 = vmul.f32 %v2100_v16, %v785_v22 }
 0x480   :  { %v787_v25 = vmul.f32 0.5, %v786_v23 }
 0x482   :  { %v788_v27 = vsub.f32 1.5, %v787_v25 }
 0x484   :  { %v789_v29 = vmul.f32 %v2100_v16, %v788_v27  ;;  %v2059_v27 = vld [vmem:[#allocation13] ss:$0 sm:$0xff] }
 0x486   :  { %v793_v36 = vsel %vm792_vm10, %v2100_v16, %v789_v29 }
 0x487   :  { %v815_v41 = vmul.f32 %v793_v36, %v2767_v43  ;;  %v289_v43 = vld [vmem:[%s3178_s13 + $0x30] sm:$0xff] }
 0x488   :  { %905 = vmatpush.msra.mxu3 %v289_v43 }
 0x489   :  { %v822_v63 = vmul.f32 %v2805_v47, %v815_v41 }
 0x48b   :  { %v2814_v1 = vadd.f32 %v2057_v38, %v822_v63 }
 0x4c0   :  { %v731_v19 = vpop.xlane.xlu1 %730 }
 0x4c1   :  { %v744_v62 = vmul.f32 %v2764_v42, %v731_v19 }
 0x4c3   :  { %v2780_v2 = vsub.f32 %v721_v51, %v744_v62  ;;  %v288_v51 = vld [vmem:[%s3178_s13 + $0x28] sm:$0xff] }
 0x4c4   :  { %906 = vmatpush.msra.mxu3 %v288_v51 }
 0x4c5   :  { %v752_v3 = vmul.f32 %v2780_v2, %v2780_v2 }
 0x4c6   :  { %907 = vmatpush.msra.mxu3 %v287_v39 }
 0x4c7   :  { %v760_v5 = vsel %vm218_vm0, %v752_v3, 0.0 }
 0x4c8   :  { %v734_v6 = vpop.xlane.xlu2 %733  ;;  %761 = vadd.xlane.f32.xlu1 %v760_v5  ;;  %v284_v5 = vld [vmem:[%s3178_s13 + $0x8] sm:$0xff] }
 0x4c9   :  { %v745_v8 = vmul.f32 %v2764_v42, %v734_v6 }
 0x4cb   :  { %v2798_v11 = vsub.f32 %v722_v55, %v745_v8  ;;  %v286_v55 = vld [vmem:[%s3178_s13 + $0x18] sm:$0xff] }
 0x4cc   :  { %908 = vmatpush.msra.mxu3 %v286_v55 }
 0x4cd   :  { %v753_v12 = vmul.f32 %v2798_v11, %v2798_v11 }
 0x4ce   :  { %909 = vmatpush.msra.mxu3 %v285_v0  ;;  %v1977_v0 = vld [vmem:[%s3201_s24 + $0x30] sm:$0xff] }
 0x4cf   :  { %v763_v13 = vsel %vm218_vm0, %v753_v12, 0.0 }
 0x4d0   :  { %764 = vadd.xlane.f32.xlu2 %v763_v13  ;;  %v756_v15 = vpop.xlane.xlu2 %755  ;;  %910 = vmatpush.msra.mxu3 %v284_v5  ;;  %v1975_v5 = vld [vmem:[%s3201_s24 + $0x20] sm:$0xff] }
 0x4d1   :  { %v766_v18 = vmul.f32 %v756_v15, %v2764_v42 }
 0x4d2   :  { %911 = vmatpush.msra.mxu3 %v283_v7 }
 0x4d3   :  { %v770_v20 = vadd.f32 1e-05, %v766_v18 }
 0x4d4   :  { %1327 = vmatpush.msrb.mxu3 %v2639_v31  ;;  %v2058_v31 = vld [vmem:[#allocation11] ss:$0 sm:$0xff] }
 0x4d5   :  { %2101 = vrsqrt.f32 %v770_v20  ;;  %vm780_vm7 = vweird.f32 %v770_v20 }
 0x4d6   :  { %1328 = vmatpush.msrb.mxu3 %v2644_v32 }
 0x4d8   :  { %1329 = vmatpush.msrb.mxu3 %v2651_v33 }
 0x4da   :  { %1330 = vmatpush.msrb.mxu3 %v2657_v34 }
 0x4db   :  { %v2102_v24 = vpop.eup %2101 }
 0x4dc   :  { %v775_v26 = vmul.f32 %v2102_v24, %v770_v20  ;;  %vm781_vm5 = vweird.f32 %v2102_v24 }
 0x4dd   :  { %vm782_vm8 = vmor %vm780_vm7, %vm781_vm5 }
 0x4de   :  { %v776_v14 = vmul.f32 %v2102_v24, %v775_v26 }
 0x4e0   :  { %v777_v28 = vmul.f32 0.5, %v776_v14 }
 0x4e2   :  { %v778_v17 = vsub.f32 1.5, %v777_v28 }
 0x4e4   :  { %v779_v30 = vmul.f32 %v2102_v24, %v778_v17 }
 0x4e6   :  { %v783_v35 = vsel %vm782_vm8, %v2102_v24, %v779_v30 }
 0x4e7   :  { %v814_v56 = vmul.f32 %v783_v35, %v746_v57 }
 0x4e9   :  { %v821_v37 = vmul.f32 %v2805_v47, %v814_v56 }
 0x4eb   :  { %v2808_v40 = vadd.f32 %v2057_v38, %v821_v37 }
 0x4ed   :  { %1967 = vmatmul.msk.f32.vlgmr.msra.gmra.mxu2 %vm218_vm0, %v2808_v40 }
 0x4f5   :  { %1968 = vmatmul.msk.f32.gmra.mxu2 %vm218_vm0, %v2814_v1 }
 0x53b   :  { %v762_v45 = vpop.xlane.xlu1 %761 }
 0x53c   :  { %v768_v46 = vmul.f32 %v762_v45, %v2764_v42 }
 0x53e   :  { %v772_v48 = vadd.f32 1e-05, %v768_v46 }
 0x540   :  { %2103 = vrsqrt.f32 %v772_v48  ;;  %vm800_vm12 = vweird.f32 %v772_v48 }
 0x543   :  { %v765_v52 = vpop.xlane.xlu2 %764 }
 0x544   :  { %v769_v53 = vmul.f32 %v765_v52, %v2764_v42 }
 0x546   :  { %v2104_v44 = vpop.eup %2103  ;;  %v773_v50 = vadd.f32 1e-05, %v769_v53 }
 0x547   :  { %v795_v57 = vmul.f32 %v2104_v44, %v772_v48  ;;  %vm801_vm11 = vweird.f32 %v2104_v44 }
 0x548   :  { %2105 = vrsqrt.f32 %v773_v50  ;;  %vm802_vm13 = vmor %vm800_vm12, %vm801_vm11  ;;  %vm810_vm15 = vweird.f32 %v773_v50 }
 0x549   :  { %v796_v58 = vmul.f32 %v2104_v44, %v795_v57 }
 0x54b   :  { %v797_v59 = vmul.f32 0.5, %v796_v58 }
 0x54d   :  { %v798_v60 = vsub.f32 1.5, %v797_v59 }
 0x54e   :  { %v2106_v61 = vpop.eup %2105 }
 0x54f   :  { %v799_v19 = vmul.f32 %v2104_v44, %v798_v60  ;;  %v805_v62 = vmul.f32 %v2106_v61, %v773_v50  ;;  %vm811_vm14 = vweird.f32 %v2106_v61 }
 0x550   :  { %vm812_vm2 = vmor %vm810_vm15, %vm811_vm14 }
 0x551   :  { %v803_v3 = vsel %vm802_vm13, %v2104_v44, %v799_v19  ;;  %v806_v21 = vmul.f32 %v2106_v61, %v805_v62 }
 0x552   :  { %v816_v4 = vmul.f32 %v803_v3, %v2780_v2 }
 0x553   :  { %v807_v6 = vmul.f32 0.5, %v806_v21  ;;  %v1976_v21 = vld [vmem:[%s3201_s24 + $0x28] sm:$0xff] }
 0x554   :  { %v823_v8 = vmul.f32 %v2805_v47, %v816_v4 }
 0x555   :  { %v808_v9 = vsub.f32 1.5, %v807_v6 }
 0x556   :  { %v830_v10 = vadd.f32 %v2057_v38, %v823_v8 }
 0x557   :  { %v809_v12 = vmul.f32 %v2106_v61, %v808_v9 }
 0x558   :  { %1969 = vmatmul.msk.f32.gmra.mxu2 %vm218_vm0, %v830_v10 }
 0x559   :  { %v813_v2 = vsel %vm812_vm2, %v2106_v61, %v809_v12  ;;  %v1978_v61 = vld [vmem:[%s3201_s24 + $0x38] sm:$0xff]  ;;  %s1923_s24 = sshll.u32 %s2428_s25, 4  ;;  %s1924_s24 = int_to_ptr.vmem [resolvable:$true] %s1923_s24 }
 0x55a   :  { %v817_v13 = vmul.f32 %v813_v2, %v2798_v11  ;;  %1098 = vmatpush.msra.mxu0 %v1978_v61 }
 0x55c   :  { %v824_v15 = vmul.f32 %v2805_v47, %v817_v13  ;;  %1099 = vmatpush.msra.mxu0 %v1977_v0 }
 0x55e   :  { %v831_v16 = vadd.f32 %v2057_v38, %v824_v15  ;;  %1100 = vmatpush.msra.mxu0 %v1976_v21 }
 0x560   :  { %1970 = vmatmul.msk.f32.gmra.mxu2 %vm218_vm0, %v831_v16  ;;  %1101 = vmatpush.msra.mxu0 %v1975_v5 }
 0x562   :  { %1427 = vmatpush.msrb.mxu0 %v2672_v54 }
 0x570   :  { %v864_v18 = vpop.f32.mrf.mxu2 }
 0x571   :  { %v865_v20 = vadd.f32 %v2058_v31, %v864_v18 }
 0x573   :  { %v876_v22 = vmax.f32 %v865_v20, 0.0 }
 0x575   :  { %1971 = vmatmul.msk.f32.vlgmr.msra.gmra.mxu3 %vm883_vm3, %v876_v22 }
 0x578   :  { %v867_v32 = vpop.f32.mrf.mxu2 }
 0x579   :  { %v868_v23 = vadd.f32 %v2058_v31, %v867_v32 }
 0x57b   :  { %v877_v24 = vmax.f32 %v868_v23, 0.0  ;;  %v2060_v23 = vld [vmem:[#allocation14] ss:$0 sm:$0xff] }
 0x57d   :  { %1972 = vmatmul.msk.f32.gmra.mxu3 %vm883_vm3, %v877_v24 }
 0x5db   :  { %v870_v33 = vpop.f32.mrf.mxu2 }
 0x5dc   :  { %v871_v11 = vadd.f32 %v2058_v31, %v870_v33 }
 0x5de   :  { %v878_v25 = vmax.f32 %v871_v11, 0.0 }
 0x5e0   :  { %1973 = vmatmul.msk.f32.gmra.mxu3 %vm883_vm3, %v878_v25  ;;  %v2061_v25 = vld [vmem:[%s3181_s16] ss:$0 sm:$0xff] }
 0x5e3   :  { %v873_v34 = vpop.f32.mrf.mxu2 }
 0x5e4   :  { %v874_v26 = vadd.f32 %v2058_v31, %v873_v34 }
 0x5e6   :  { %v879_v14 = vmax.f32 %v874_v26, 0.0 }
 0x5e8   :  { %1974 = vmatmul.msk.f32.gmra.mxu3 %vm883_vm3, %v879_v14 }
 0x5f8   :  { %v913_v28 = vpop.f32.mrf.mxu3 }
 0x5f9   :  { %v914_v17 = vadd.f32 %v2059_v27, %v913_v28 }
 0x5fb   :  { %v925_v29 = vadd.f32 %v914_v17, %v2808_v40 }
 0x5fd   :  { %v929_v30 = vsel %vm218_vm0, %v925_v29, 0.0 }
 0x5fe   :  { %930 = vadd.xlane.f32.xlu0 %v929_v30 }
 0x600   :  { %v916_v35 = vpop.f32.mrf.mxu3 }
 0x601   :  { %v917_v47 = vadd.f32 %v2059_v27, %v916_v35 }
 0x603   :  { %v926_v56 = vadd.f32 %v917_v47, %v2814_v1 }
 0x605   :  { %v932_v36 = vsel %vm218_vm0, %v926_v56, 0.0 }
 0x606   :  { %933 = vadd.xlane.f32.xlu1 %v932_v36 }
 0x663   :  { %v919_v37 = vpop.f32.mrf.mxu3 }
 0x664   :  { %v920_v38 = vadd.f32 %v2059_v27, %v919_v37 }
 0x666   :  { %v927_v41 = vadd.f32 %v920_v38, %v830_v10 }
 0x668   :  { %v935_v63 = vsel %vm218_vm0, %v927_v41, 0.0 }
 0x669   :  { %936 = vadd.xlane.f32.xlu2 %v935_v63 }
 0x66b   :  { %v922_v45 = vpop.f32.mrf.mxu3 }
 0x66c   :  { %v923_v46 = vadd.f32 %v2059_v27, %v922_v45 }
 0x66e   :  { %v928_v48 = vadd.f32 %v923_v46, %v831_v16 }
 0x670   :  { %v938_v40 = vsel %vm218_vm0, %v928_v48, 0.0 }
 0x671   :  { %939 = vadd.xlane.f32.xlu0 %v938_v40  ;;  %v931_v49 = vpop.xlane.xlu0 %930 }
 0x672   :  { %v941_v43 = vmul.f32 %v931_v49, %v2764_v42 }
 0x674   :  { %v945_v51 = vsub.f32 %v925_v29, %v941_v43 }
 0x676   :  { %v949_v1 = vmul.f32 %v945_v51, %v945_v51 }
 0x678   :  { %v953_v52 = vsel %vm218_vm0, %v949_v1, 0.0 }
 0x679   :  { %v934_v53 = vpop.xlane.xlu1 %933  ;;  %954 = vadd.xlane.f32.xlu1 %v953_v52 }
 0x67a   :  { %v942_v39 = vmul.f32 %v934_v53, %v2764_v42 }
 0x67c   :  { %v946_v44 = vsub.f32 %v926_v56, %v942_v39 }
 0x67e   :  { %v950_v50 = vmul.f32 %v946_v44, %v946_v44 }
 0x680   :  { %v956_v55 = vsel %vm218_vm0, %v950_v50, 0.0 }
 0x681   :  { %957 = vadd.xlane.f32.xlu2 %v956_v55 }
 0x6dc   :  { %v937_v57 = vpop.xlane.xlu2 %936 }
 0x6dd   :  { %v943_v58 = vmul.f32 %v937_v57, %v2764_v42 }
 0x6df   :  { %v2869_v59 = vsub.f32 %v927_v41, %v943_v58 }
 0x6e1   :  { %v951_v60 = vmul.f32 %v2869_v59, %v2869_v59 }
 0x6e3   :  { %v959_v19 = vsel %vm218_vm0, %v951_v60, 0.0 }
 0x6e4   :  { %960 = vadd.xlane.f32.xlu0 %v959_v19  ;;  %v940_v62 = vpop.xlane.xlu0 %939 }
 0x6e5   :  { %v944_v3 = vmul.f32 %v940_v62, %v2764_v42 }
 0x6e7   :  { %v2884_v4 = vsub.f32 %v928_v48, %v944_v3 }
 0x6e9   :  { %v952_v6 = vmul.f32 %v2884_v4, %v2884_v4 }
 0x6eb   :  { %v962_v7 = vsel %vm218_vm0, %v952_v6, 0.0 }
 0x6ec   :  { %v955_v8 = vpop.xlane.xlu1 %954  ;;  %963 = vadd.xlane.f32.xlu1 %v962_v7 }
 0x6ed   :  { %v965_v9 = vmul.f32 %v955_v8, %v2764_v42 }
 0x6ef   :  { %v969_v10 = vadd.f32 1e-05, %v965_v9 }
 0x6f1   :  { %2107 = vrsqrt.f32 %v969_v10  ;;  %vm979_vm5 = vweird.f32 %v969_v10 }
 0x6f4   :  { %v958_v12 = vpop.xlane.xlu2 %957 }
 0x6f5   :  { %v966_v2 = vmul.f32 %v958_v12, %v2764_v42 }
 0x6f7   :  { %v2108_v13 = vpop.eup %2107  ;;  %v970_v15 = vadd.f32 1e-05, %v966_v2 }
 0x6f8   :  { %v974_v16 = vmul.f32 %v2108_v13, %v969_v10  ;;  %vm980_vm4 = vweird.f32 %v2108_v13 }
 0x6f9   :  { %2109 = vrsqrt.f32 %v970_v15  ;;  %vm981_vm6 = vmor %vm979_vm5, %vm980_vm4  ;;  %vm989_vm8 = vweird.f32 %v970_v15 }
 0x6fa   :  { %v975_v31 = vmul.f32 %v2108_v13, %v974_v16 }
 0x6fc   :  { %v976_v18 = vmul.f32 0.5, %v975_v31 }
 0x6fe   :  { %v977_v20 = vsub.f32 1.5, %v976_v18 }
 0x6ff   :  { %v2110_v54 = vpop.eup %2109 }
 0x700   :  { %v978_v22 = vmul.f32 %v2108_v13, %v977_v20  ;;  %v984_v32 = vmul.f32 %v2110_v54, %v970_v15  ;;  %vm990_vm7 = vweird.f32 %v2110_v54 }
 0x701   :  { %vm991_vm9 = vmor %vm989_vm8, %vm990_vm7 }
 0x702   :  { %v982_v24 = vsel %vm981_vm6, %v2108_v13, %v978_v22  ;;  %v985_v33 = vmul.f32 %v2110_v54, %v984_v32 }
 0x703   :  { %v1013_v11 = vmul.f32 %v982_v24, %v945_v51 }
 0x704   :  { %v986_v34 = vmul.f32 0.5, %v985_v33 }
 0x705   :  { %v1020_v26 = vmul.f32 %v2060_v23, %v1013_v11 }
 0x706   :  { %v987_v14 = vsub.f32 1.5, %v986_v34 }
 0x707   :  { %v2898_v27 = vadd.f32 %v2061_v25, %v1020_v26 }
 0x708   :  { %v988_v28 = vmul.f32 %v2110_v54, %v987_v14 }
 0x709   :  { %1998 = vmatmul.msk.f32.vlgmr.msra.gmra.mxu0 %vm218_vm0, %v2898_v27 }
 0x70a   :  { %v992_v17 = vsel %vm991_vm9, %v2110_v54, %v988_v28 }
 0x70b   :  { %v1014_v29 = vmul.f32 %v992_v17, %v946_v44 }
 0x70d   :  { %v1021_v30 = vmul.f32 %v2060_v23, %v1014_v29 }
 0x70f   :  { %v2902_v35 = vadd.f32 %v2061_v25, %v1021_v30 }
 0x711   :  { %1999 = vmatmul.msk.f32.gmra.mxu0 %vm218_vm0, %v2902_v35 }
 0x757   :  { %v961_v47 = vpop.xlane.xlu0 %960 }
 0x758   :  { %v967_v56 = vmul.f32 %v961_v47, %v2764_v42 }
 0x75a   :  { %v971_v36 = vadd.f32 1e-05, %v967_v56 }
 0x75c   :  { %2111 = vrsqrt.f32 %v971_v36  ;;  %vm999_vm11 = vweird.f32 %v971_v36 }
 0x75f   :  { %v964_v37 = vpop.xlane.xlu1 %963 }
 0x760   :  { %v968_v38 = vmul.f32 %v964_v37, %v2764_v42 }
 0x762   :  { %v2112_v41 = vpop.eup %2111  ;;  %v972_v63 = vadd.f32 1e-05, %v968_v38 }
 0x763   :  { %v994_v45 = vmul.f32 %v2112_v41, %v971_v36  ;;  %vm1000_vm10 = vweird.f32 %v2112_v41 }
 0x764   :  { %2113 = vrsqrt.f32 %v972_v63  ;;  %vm1001_vm12 = vmor %vm999_vm11, %vm1000_vm10  ;;  %vm1009_vm14 = vweird.f32 %v972_v63 }
 0x765   :  { %v995_v46 = vmul.f32 %v2112_v41, %v994_v45 }
 0x767   :  { %v996_v48 = vmul.f32 0.5, %v995_v46 }
 0x769   :  { %v997_v40 = vsub.f32 1.5, %v996_v48 }
 0x76a   :  { %v2114_v49 = vpop.eup %2113 }
 0x76b   :  { %v998_v43 = vmul.f32 %v2112_v41, %v997_v40  ;;  %v1004_v51 = vmul.f32 %v2114_v49, %v972_v63  ;;  %vm1010_vm13 = vweird.f32 %v2114_v49 }
 0x76c   :  { %vm1011_vm15 = vmor %vm1009_vm14, %vm1010_vm13 }
 0x76d   :  { %v1002_v1 = vsel %vm1001_vm12, %v2112_v41, %v998_v43  ;;  %v1005_v52 = vmul.f32 %v2114_v49, %v1004_v51 }
 0x76e   :  { %v1015_v53 = vmul.f32 %v1002_v1, %v2869_v59  ;;  %v2062_v59 = vld [vmem:[%s3171_s6 + $0x1] ss:$0 sm:$0xff] }
 0x76f   :  { %v1006_v39 = vmul.f32 0.5, %v1005_v52 }
 0x770   :  { %v1022_v44 = vmul.f32 %v2060_v23, %v1015_v53 }
 0x771   :  { %v1007_v50 = vsub.f32 1.5, %v1006_v39 }
 0x772   :  { %v2909_v55 = vadd.f32 %v2061_v25, %v1022_v44 }
 0x773   :  { %v1008_v57 = vmul.f32 %v2114_v49, %v1007_v50 }
 0x774   :  { %2000 = vmatmul.msk.f32.gmra.mxu0 %vm218_vm0, %v2909_v55 }
 0x775   :  { %v1012_v58 = vsel %vm1011_vm15, %v2114_v49, %v1008_v57 }
 0x776   :  { %v1016_v60 = vmul.f32 %v1012_v58, %v2884_v4 }
 0x778   :  { %v1023_v61 = vmul.f32 %v2060_v23, %v1016_v60 }
 0x77a   :  { %v2914_v19 = vadd.f32 %v2061_v25, %v1023_v61 }
 0x77c   :  { %2001 = vmatmul.msk.f32.gmra.mxu0 %vm218_vm0, %v2914_v19 }
 0x786   :  { %v1103_v62 = vpop.f32.mrf.mxu0 }
 0x787   :  { %v1104_v0 = vadd.f32 %v2062_v59, %v1103_v62 }
 0x789   :  { %1123 = vrot.lane.b32.xlu2 %v1104_v0, %s2425_s27  ;;  %v1115_v4 = vmul.f32 0.5, %v1104_v0 }
 0x78e   :  { %v1106_v3 = vpop.f32.mrf.mxu0 }
 0x78f   :  { %v1107_v21 = vadd.f32 %v2062_v59, %v1106_v3 }
 0x791   :  { %1125 = vrot.lane.b32.xlu0 %v1107_v21, %s2425_s27  ;;  %1277 = vrot.lane.b32.xlu2 %v1104_v0, %s2424_s29  ;;  %v1116_v13 = vmul.f32 0.5, %v1107_v21 }
 0x7e3   :  { %v1124_v5 = vpop.permute.xlu2 %1123 }
 0x7e4   :  { %v1135_v6 = vmul.f32 %v1124_v5, %v1115_v4 }
 0x7e6   :  { %2002 = vmatmul.msk.f32.vlgmr.msrb.gmra.mxu1 %vm218_vm0, %v1135_v6 }
 0x7f1   :  { %v1109_v7 = vpop.f32.mrf.mxu0 }
 0x7f2   :  { %v1110_v8 = vadd.f32 %v2062_v59, %v1109_v7 }
 0x7f4   :  { %v1117_v9 = vmul.f32 0.5, %v1110_v8  ;;  %1127 = vrot.lane.b32.xlu1 %v1110_v8, %s2425_s27 }
 0x7f6   :  { %v1299_v10 = vmul.f32 %v1124_v5, %v1117_v9 }
 0x7f8   :  { %2010 = vmatmul.msk.f32.vlgmr.msrb.gmra.mxu3 %vm218_vm0, %v1299_v10 }
 0x7f9   :  { %v1112_v12 = vpop.f32.mrf.mxu0 }
 0x7fa   :  { %v1113_v2 = vadd.f32 %v2062_v59, %v1112_v12 }
 0x7fc   :  { %1283 = vrot.lane.b32.xlu2 %v1113_v2, %s2424_s29  ;;  %1129 = vrot.lane.b32.xlu0 %v1113_v2, %s2425_s27  ;;  %v1118_v15 = vmul.f32 0.5, %v1113_v2 }
 0x7fd   :  { %1281 = vrot.lane.b32.xlu1 %v1110_v8, %s2424_s29 }
 0x803   :  { %v1126_v16 = vpop.permute.xlu0 %1125 }
 0x804   :  { %v1136_v31 = vmul.f32 %v1126_v16, %v1116_v13  ;;  %v1300_v18 = vmul.f32 %v1126_v16, %v1118_v15  ;;  %1279 = vrot.lane.b32.xlu0 %v1107_v21, %s2424_s29 }
 0x806   :  { %2003 = vmatmul.msk.f32.gmra.mxu1 %vm218_vm0, %v1136_v31  ;;  %2011 = vmatmul.msk.f32.gmra.mxu3 %vm218_vm0, %v1300_v18 }
 0x863   :  { %v1168_v33 = vpop.f32.mrf.mxu1 }
 0x864   :  { %v1180_v14 = vsel %vm403_vm1, %v1168_v33, -inf }
 0x866   :  { %v1128_v20 = vpop.permute.xlu1 %1127 }
 0x867   :  { %v1137_v54 = vmul.f32 %v1128_v20, %v1115_v4  ;;  %v1301_v22 = vmul.f32 %v1128_v20, %v1117_v9 }
 0x869   :  { %2004 = vmatmul.msk.f32.gmra.mxu1 %vm218_vm0, %v1137_v54  ;;  %2012 = vmatmul.msk.f32.gmra.mxu3 %vm218_vm0, %v1301_v22 }
 0x86e   :  { %v1130_v32 = vpop.permute.xlu0 %1129 }
 0x86f   :  { %v1138_v23 = vmul.f32 %v1130_v32, %v1116_v13  ;;  %v1302_v24 = vmul.f32 %v1130_v32, %v1118_v15 }
 0x871   :  { %2005 = vmatmul.msk.f32.gmra.mxu1 %vm218_vm0, %v1138_v23  ;;  %2013 = vmatmul.msk.f32.gmra.mxu3 %vm218_vm0, %v1302_v24 }
 0x87b   :  { %v1332_v11 = vpop.f32.mrf.mxu3 }
 0x87c   :  { %v1344_v37 = vsel %vm403_vm1, %v1332_v11, -inf }
 0x883   :  { %v1171_v25 = vpop.f32.mrf.mxu1 }
 0x884   :  { %v1183_v45 = vsel %vm403_vm1, %v1171_v25, -inf }
 0x889   :  { %v1335_v34 = vpop.f32.mrf.mxu3 }
 0x88a   :  { %v1347_v58 = vsel %vm403_vm1, %v1335_v34, -inf }
 0x8e6   :  { %v1174_v26 = vpop.f32.mrf.mxu1 }
 0x8e7   :  { %v1181_v28 = vsel %vm403_vm1, %v1174_v26, -inf }
 0x8e8   :  { %v1182_v17 = vmax.f32 %v1180_v14, %v1181_v28 }
 0x8ea   :  { %v1186_v29 = vsub.f32 %v1168_v33, %v1182_v17  ;;  %v1188_v30 = vsub.f32 %v1174_v26, %v1182_v17 }
 0x8ec   :  { %v1190_v47 = vmul.f32 1.442695, %v1186_v29  ;;  %v1194_v56 = vmul.f32 1.442695, %v1188_v30  ;;  %v1338_v36 = vpop.f32.mrf.mxu3 }
 0x8ed   :  { %v1345_v38 = vsel %vm403_vm1, %v1338_v36, -inf }
 0x8ee   :  { %2115 = vpow2.f32 %v1190_v47  ;;  %v1346_v41 = vmax.f32 %v1344_v37, %v1345_v38  ;;  %v1177_v63 = vpop.f32.mrf.mxu1 }
 0x8ef   :  { %2117 = vpow2.f32 %v1194_v56  ;;  %v1184_v46 = vsel %vm403_vm1, %v1177_v63, -inf }
 0x8f0   :  { %v1350_v48 = vsub.f32 %v1332_v11, %v1346_v41  ;;  %v1352_v40 = vsub.f32 %v1338_v36, %v1346_v41  ;;  %v1185_v49 = vmax.f32 %v1183_v45, %v1184_v46  ;;  %v1983_v45 = vld [vmem:[%s3172_s7 + $0x38] sm:$0xff]  ;;  %v1982_v46 = vld [vmem:[%s3172_s7 + $0x30] sm:$0xff] }
 0x8f1   :  { %1478 = vmatpush.msra.mxu1 %v1983_v45 }
 0x8f2   :  { %v1354_v43 = vmul.f32 1.442695, %v1350_v48  ;;  %v1358_v51 = vmul.f32 1.442695, %v1352_v40  ;;  %v1187_v1 = vsub.f32 %v1171_v25, %v1185_v49  ;;  %v1189_v52 = vsub.f32 %v1177_v63, %v1185_v49 }
 0x8f3   :  { %1479 = vmatpush.msra.mxu1 %v1982_v46 }
 0x8f4   :  { %v2116_v53 = vpop.eup %2115  ;;  %2119 = vpow2.f32 %v1354_v43  ;;  %v1192_v39 = vmul.f32 1.442695, %v1187_v1  ;;  %v1196_v44 = vmul.f32 1.442695, %v1189_v52  ;;  %v1341_v50 = vpop.f32.mrf.mxu3 }
 0x8f5   :  { %v2943_v57 = vpop.eup %2117  ;;  %v1198_v60 = vsel %vm403_vm1, %v2116_v53, 0.0  ;;  %2121 = vpow2.f32 %v1358_v51  ;;  %v1348_v61 = vsel %vm403_vm1, %v1341_v50, -inf }
 0x8f6   :  { %v1199_v59 = vsel %vm403_vm1, %v2943_v57, 0.0  ;;  %2123 = vpow2.f32 %v1192_v39  ;;  %v1349_v62 = vmax.f32 %v1347_v58, %v1348_v61 }
 0x8f7   :  { %v1200_v0 = vadd.f32 %v1199_v59, %v1198_v60  ;;  %2125 = vpow2.f32 %v1196_v44 }
 0x8f8   :  { %v1351_v3 = vsub.f32 %v1335_v34, %v1349_v62  ;;  %v1353_v21 = vsub.f32 %v1341_v50, %v1349_v62 }
 0x8f9   :  { %2127 = vrcp.f32 %v1200_v0  ;;  %v1215_v23 = vand.u32 2147483648, %v1200_v0  ;;  %v1213_v11 = vand.u32 2147483647, %v1200_v0  ;;  %vm1209_vm4 = vweird.f32 %v1200_v0 }
 0x8fa   :  { %v2950_v4 = vpop.eup %2119  ;;  %v1356_v5 = vmul.f32 1.442695, %v1351_v3  ;;  %v1360_v6 = vmul.f32 1.442695, %v1353_v21 }
 0x8fb   :  { %v2952_v7 = vpop.eup %2121  ;;  %v1362_v8 = vsel %vm403_vm1, %v2950_v4, 0.0  ;;  %v1216_v17 = vor.u32 1.1754944e-38, %v1215_v23  ;;  %vm1214_vm6 = vcmp.eq.f32.partialorder %v1213_v11, 8.507059e+37 }
 0x8fc   :  { %v2956_v9 = vpop.eup %2123  ;;  %v1363_v10 = vsel %vm403_vm1, %v2952_v7, 0.0  ;;  %2129 = vpow2.f32 %v1356_v5 }
 0x8fd   :  { %v2960_v12 = vpop.eup %2125  ;;  %v1364_v2 = vadd.f32 %v1363_v10, %v1362_v8  ;;  %v1201_v13 = vsel %vm403_vm1, %v2956_v9, 0.0  ;;  %2131 = vpow2.f32 %v1360_v6 }
 0x8fe   :  { %v1202_v15 = vsel %vm403_vm1, %v2960_v12, 0.0 }
 0x8ff   :  { %v2128_v16 = vpop.eup %2127  ;;  %2133 = vrcp.f32 %v1364_v2  ;;  %v1203_v31 = vadd.f32 %v1202_v15, %v1201_v13  ;;  %v1377_v36 = vand.u32 2147483647, %v1364_v2  ;;  %v1379_v37 = vand.u32 2147483648, %v1364_v2 }
 0x900   :  { %v1205_v18 = vmul.f32 %v2128_v16, %v1200_v0  ;;  %vm1210_vm2 = vweird.f32 %v2128_v16  ;;  %vm1373_vm8 = vweird.f32 %v1364_v2 }
 0x901   :  { %2135 = vrcp.f32 %v1203_v31  ;;  %vm1211_vm5 = vmor %vm1209_vm4, %vm1210_vm2  ;;  %v1230_v48 = vand.u32 2147483648, %v1203_v31  ;;  %v1228_v43 = vand.u32 2147483647, %v1203_v31  ;;  %vm1378_vm11 = vcmp.eq.f32.partialorder %v1377_v36, 8.507059e+37 }
 0x902   :  { %v2966_v20 = vpop.eup %2129  ;;  %v1206_v54 = vsub.f32 1.0, %v1205_v18  ;;  %v1380_v1 = vor.u32 1.1754944e-38, %v1379_v37  ;;  %vm1224_vm12 = vweird.f32 %v1203_v31 }
 0x903   :  { %v2968_v22 = vpop.eup %2131  ;;  %v1365_v32 = vsel %vm403_vm1, %v2966_v20, 0.0  ;;  %v1231_v50 = vor.u32 1.1754944e-38, %v1230_v48  ;;  %vm1229_vm14 = vcmp.eq.f32.partialorder %v1228_v43, 8.507059e+37  ;;  %v2063_v43 = vld [vmem:[%s3173_s8 + $0x1] ss:$0 sm:$0xff] }
 0x904   :  { %v1366_v24 = vsel %vm403_vm1, %v2968_v22, 0.0  ;;  %v1207_v33 = vmul.f32 %v2128_v16, %v1206_v54 }
 0x905   :  { %v2134_v25 = vpop.eup %2133  ;;  %v1367_v34 = vadd.f32 %v1366_v24, %v1365_v32  ;;  %v1282_v32 = vpop.permute.xlu1 %1281 }
 0x906   :  { %v1369_v26 = vmul.f32 %v2134_v25, %v1364_v2  ;;  %v1208_v14 = vadd.f32 %v2128_v16, %v1207_v33  ;;  %vm1374_vm7 = vweird.f32 %v2134_v25 }
 0x907   :  { %v2136_v28 = vpop.eup %2135  ;;  %2137 = vrcp.f32 %v1367_v34  ;;  %vm1375_vm10 = vmor %vm1373_vm8, %vm1374_vm7  ;;  %v1394_v62 = vand.u32 2147483648, %v1367_v34  ;;  %v1392_v21 = vand.u32 2147483647, %v1367_v34  ;;  %vm1388_vm2 = vweird.f32 %v1367_v34 }
 0x908   :  { %v1212_v29 = vsel %vm1211_vm5, %v2128_v16, %v1208_v14  ;;  %v1370_v30 = vsub.f32 1.0, %v1369_v26  ;;  %v1220_v47 = vmul.f32 %v2136_v28, %v1203_v31  ;;  %vm1225_vm9 = vweird.f32 %v2136_v28  ;;  %v1981_v16 = vld [vmem:[%s3172_s7 + $0x28] sm:$0xff] }
 0x909   :  { %v1217_v56 = vsel %vm1214_vm6, %v1216_v17, %v1212_v29  ;;  %vm1226_vm13 = vmor %vm1224_vm12, %vm1225_vm9  ;;  %v1395_v6 = vor.u32 1.1754944e-38, %v1394_v62  ;;  %vm1393_vm5 = vcmp.eq.f32.partialorder %v1392_v21, 8.507059e+37  ;;  %1480 = vmatpush.msra.mxu1 %v1981_v16 }
 0x90a   :  { %v1218_v38 = vmul.f32 %v2116_v53, %v1217_v56  ;;  %v1371_v41 = vmul.f32 %v2134_v25, %v1370_v30  ;;  %v1221_v63 = vsub.f32 1.0, %v1220_v47  ;;  %v1234_v2 = vmul.f32 %v2943_v57, %v1217_v56  ;;  %v1980_v57 = vld [vmem:[%s3172_s7 + $0x20] sm:$0xff] }
 0x90b   :  { %1481 = vmatpush.msra.mxu1 %v1980_v57 }
 0x90c   :  { %2006 = vmatmul.msk.f32.vlgmr.msrb.gmra.mxu2 %vm403_vm1, %v1218_v38  ;;  %v1372_v40 = vadd.f32 %v2134_v25, %v1371_v41  ;;  %v1222_v49 = vmul.f32 %v2136_v28, %v1221_v63 }
 0x90d   :  { %v2138_v51 = vpop.eup %2137 }
 0x90e   :  { %v1376_v52 = vsel %vm1375_vm10, %v2134_v25, %v1372_v40  ;;  %v1223_v53 = vadd.f32 %v2136_v28, %v1222_v49  ;;  %v1384_v39 = vmul.f32 %v2138_v51, %v1367_v34  ;;  %vm1389_vm15 = vweird.f32 %v2138_v51  ;;  %v1280_v25 = vpop.permute.xlu0 %1279 }
 0x90f   :  { %v1381_v44 = vsel %vm1378_vm11, %v1380_v1, %v1376_v52  ;;  %vm1390_vm4 = vmor %vm1388_vm2, %vm1389_vm15 }
 0x910   :  { %v1382_v58 = vmul.f32 %v2950_v4, %v1381_v44  ;;  %v1227_v60 = vsel %vm1226_vm13, %v2136_v28, %v1223_v53  ;;  %v1385_v61 = vsub.f32 1.0, %v1384_v39 }
 0x911   :  { %v1232_v59 = vsel %vm1229_vm14, %v1231_v50, %v1227_v60 }
 0x912   :  { %2014 = vmatmul.msk.f32.vlgmr.msrb.gmra.mxu0 %vm403_vm1, %v1382_v58  ;;  %v1233_v0 = vmul.f32 %v2956_v9, %v1232_v59  ;;  %v1386_v3 = vmul.f32 %v2138_v51, %v1385_v61  ;;  %v1398_v9 = vmul.f32 %v2952_v7, %v1381_v44  ;;  %v1235_v13 = vmul.f32 %v2960_v12, %v1232_v59  ;;  %v1278_v12 = vpop.permute.xlu2 %1277 }
 0x914   :  { %2007 = vmatmul.msk.f32.gmra.mxu2 %vm403_vm1, %v1233_v0  ;;  %v1387_v5 = vadd.f32 %v2138_v51, %v1386_v3 }
 0x916   :  { %v1391_v8 = vsel %vm1390_vm4, %v2138_v51, %v1387_v5 }
 0x917   :  { %v1396_v4 = vsel %vm1393_vm5, %v1395_v6, %v1391_v8 }
 0x918   :  { %v1397_v10 = vmul.f32 %v2966_v20, %v1396_v4  ;;  %v1399_v15 = vmul.f32 %v2968_v22, %v1396_v4 }
 0x91a   :  { %2015 = vmatmul.msk.f32.gmra.mxu0 %vm403_vm1, %v1397_v10  ;;  %v1284_v34 = vpop.permute.xlu2 %1283 }
 0x91c   :  { %2008 = vmatmul.msk.f32.gmra.mxu2 %vm403_vm1, %v1234_v2 }
 0x922   :  { %2016 = vmatmul.msk.f32.gmra.mxu0 %vm403_vm1, %v1398_v9 }
 0x924   :  { %2009 = vmatmul.msk.f32.gmra.mxu2 %vm403_vm1, %v1235_v13 }
 0x92a   :  { %2017 = vmatmul.msk.f32.gmra.mxu0 %vm403_vm1, %v1399_v15 }
 0x98f   :  { %v1265_v7 = vpop.f32.mrf.mxu2  ;;  %v1429_v31 = vpop.f32.mrf.mxu0 }
 0x990   :  { %v1289_v54 = vmul.f32 %v1278_v12, %v1265_v7  ;;  %v1441_v36 = vmul.f32 %v1429_v31, %v1278_v12 }
 0x992   :  { %v1293_v24 = vsel %vm218_vm0, %v1289_v54, 0.0  ;;  %v1445_v41 = vsel %vm218_vm0, %v1441_v36, 0.0 }
 0x997   :  { %v1268_v18 = vpop.f32.mrf.mxu2  ;;  %v1432_v20 = vpop.f32.mrf.mxu0 }
 0x998   :  { %v1290_v26 = vmul.f32 %v1280_v25, %v1268_v18  ;;  %v1442_v46 = vmul.f32 %v1432_v20, %v1280_v25 }
 0x99a   :  { %v1296_v29 = vsel %vm218_vm0, %v1290_v26, 0.0  ;;  %v1448_v40 = vsel %vm218_vm0, %v1442_v46, 0.0  ;;  %v1996_v46 = vld [vmem:[%s3178_s13 + $0x78] sm:$0xff] }
 0x99b   :  { %1672 = vmatpush.msra.mxu3 %v1996_v46 }
 0x99f   :  { %v1271_v22 = vpop.f32.mrf.mxu2  ;;  %v1435_v14 = vpop.f32.mrf.mxu0 }
 0x9a0   :  { %v1291_v23 = vmul.f32 %v1282_v32, %v1271_v22  ;;  %v1443_v56 = vmul.f32 %v1435_v14, %v1282_v32  ;;  %v1987_v22 = vld [vmem:[%s3176_s11 + $0x30] sm:$0xff] }
 0x9a2   :  { %v1294_v33 = vsel %vm218_vm0, %v1291_v23, 0.0  ;;  %v1446_v37 = vsel %vm218_vm0, %v1443_v56, 0.0  ;;  %v1986_v23 = vld [vmem:[%s3176_s11 + $0x28] sm:$0xff] }
 0x9a3   :  { %v1295_v11 = vadd.f32 %v1294_v33, %v1293_v24  ;;  %v1447_v63 = vadd.f32 %v1446_v37, %v1445_v41  ;;  %v1985_v24 = vld [vmem:[%s3176_s11 + $0x20] sm:$0xff]  ;;  %v3059_v41 = vld [vmem:[#allocation8 + $0x1] ss:$0 sm:$0xff] }
 0x9a5   :  { %2018 = vmatmul.msk.f32.vlgmr.msra.gmra.mxu1 %vm218_vm0, %v1295_v11 }
 0x9a7   :  { %v1274_v28 = vpop.f32.mrf.mxu2  ;;  %v1438_v38 = vpop.f32.mrf.mxu0 }
 0x9a8   :  { %v1292_v17 = vmul.f32 %v1284_v34, %v1274_v28  ;;  %v1444_v45 = vmul.f32 %v1438_v38, %v1284_v34 }
 0x9aa   :  { %v1297_v30 = vsel %vm218_vm0, %v1292_v17, 0.0  ;;  %v1449_v48 = vsel %vm218_vm0, %v1444_v45, 0.0 }
 0x9ab   :  { %v1298_v47 = vadd.f32 %v1297_v30, %v1296_v29  ;;  %v1450_v49 = vadd.f32 %v1449_v48, %v1448_v40  ;;  %v1995_v48 = vld [vmem:[%s3178_s13 + $0x70] sm:$0xff] }
 0x9ac   :  { %1673 = vmatpush.msra.mxu3 %v1995_v48 }
 0x9ad   :  { %2019 = vmatmul.msk.f32.gmra.mxu1 %vm218_vm0, %v1298_v47 }
 0x9b5   :  { %2020 = vmatmul.msk.f32.gmra.mxu1 %vm218_vm0, %v1447_v63 }
 0x9bd   :  { %2021 = vmatmul.msk.f32.gmra.mxu1 %vm218_vm0, %v1450_v49 }
 0xa22   :  { %v1483_v51 = vpop.f32.mrf.mxu1 }
 0xa23   :  { %v1484_v1 = vadd.f32 %v2063_v43, %v1483_v51  ;;  %v2065_v51 = vld [vmem:[#allocation10 + $0x1] ss:$0 sm:$0xff] }
 0xa25   :  { %v1495_v52 = vadd.f32 %v1484_v1, %v2898_v27  ;;  %v1994_v1 = vld [vmem:[%s3178_s13 + $0x68] sm:$0xff] }
 0xa26   :  { %1674 = vmatpush.msra.mxu3 %v1994_v1 }
 0xa27   :  { %v1499_v53 = vsel %vm218_vm0, %v1495_v52, 0.0 }
 0xa28   :  { %1500 = vadd.xlane.f32.xlu1 %v1499_v53 }
 0xa2a   :  { %v1486_v39 = vpop.f32.mrf.mxu1 }
 0xa2b   :  { %v1487_v44 = vadd.f32 %v2063_v43, %v1486_v39 }
 0xa2d   :  { %v1496_v50 = vadd.f32 %v1487_v44, %v2902_v35  ;;  %v1988_v35 = vld [vmem:[%s3176_s11 + $0x38] sm:$0xff] }
 0xa2e   :  { %1628 = vmatpush.msra.mxu2 %v1988_v35 }
 0xa2f   :  { %v1502_v58 = vsel %vm218_vm0, %v1496_v50, 0.0 }
 0xa30   :  { %1503 = vadd.xlane.f32.xlu0 %v1502_v58  ;;  %1629 = vmatpush.msra.mxu2 %v1987_v22 }
 0xa32   :  { %v1489_v60 = vpop.f32.mrf.mxu1  ;;  %1630 = vmatpush.msra.mxu2 %v1986_v23 }
 0xa33   :  { %v1490_v61 = vadd.f32 %v2063_v43, %v1489_v60 }
 0xa34   :  { %1631 = vmatpush.msra.mxu2 %v1985_v24 }
 0xa35   :  { %v1497_v59 = vadd.f32 %v1490_v61, %v2909_v55 }
 0xa37   :  { %v1505_v62 = vsel %vm218_vm0, %v1497_v59, 0.0 }
 0xa38   :  { %1506 = vadd.xlane.f32.xlu2 %v1505_v62  ;;  %v1992_v62 = vld [vmem:[%s3178_s13 + $0x58] sm:$0xff] }
 0xa3a   :  { %v1492_v0 = vpop.f32.mrf.mxu1 }
 0xa3b   :  { %v1493_v3 = vadd.f32 %v2063_v43, %v1492_v0 }
 0xa3d   :  { %v1498_v27 = vadd.f32 %v1493_v3, %v2914_v19 }
 0xa3f   :  { %v1508_v21 = vsel %vm218_vm0, %v1498_v27, 0.0 }
 0xa40   :  { %1509 = vadd.xlane.f32.xlu1 %v1508_v21 }
 0xa9b   :  { %v1501_v5 = vpop.xlane.xlu1 %1500 }
 0xa9c   :  { %v1511_v6 = vmul.f32 %v1501_v5, %v2764_v42 }
 0xa9e   :  { %v1515_v8 = vsub.f32 %v1495_v52, %v1511_v6  ;;  %v1990_v6 = vld [vmem:[%s3178_s13 + $0x48] sm:$0xff] }
 0xaa0   :  { %v1519_v55 = vmul.f32 %v1515_v8, %v1515_v8 }
 0xaa2   :  { %v1523_v4 = vsel %vm218_vm0, %v1519_v55, 0.0 }
 0xaa3   :  { %1524 = vadd.xlane.f32.xlu0 %v1523_v4  ;;  %v1504_v10 = vpop.xlane.xlu0 %1503 }
 0xaa4   :  { %v1512_v2 = vmul.f32 %v1504_v10, %v2764_v42 }
 0xaa6   :  { %v3030_v19 = vsub.f32 %v1496_v50, %v1512_v2  ;;  %v1993_v50 = vld [vmem:[%s3178_s13 + $0x60] sm:$0xff] }
 0xaa7   :  { %1675 = vmatpush.msra.mxu3 %v1993_v50 }
 0xaa8   :  { %v1520_v9 = vmul.f32 %v3030_v19, %v3030_v19 }
 0xaa9   :  { %1676 = vmatpush.msra.mxu3 %v1992_v62 }
 0xaaa   :  { %v1526_v13 = vsel %vm218_vm0, %v1520_v9, 0.0 }
 0xaab   :  { %v1507_v15 = vpop.xlane.xlu2 %1506  ;;  %1527 = vadd.xlane.f32.xlu2 %v1526_v13 }
 0xaac   :  { %v1513_v16 = vmul.f32 %v1507_v15, %v2764_v42 }
 0xaae   :  { %v3036_v57 = vsub.f32 %v1497_v59, %v1513_v16 }
 0xab0   :  { %v1521_v7 = vmul.f32 %v3036_v57, %v3036_v57 }
 0xab2   :  { %v1529_v31 = vsel %vm218_vm0, %v1521_v7, 0.0 }
 0xab3   :  { %1530 = vadd.xlane.f32.xlu1 %v1529_v31  ;;  %v1510_v18 = vpop.xlane.xlu1 %1509 }
 0xab4   :  { %v1514_v12 = vmul.f32 %v1510_v18, %v2764_v42 }
 0xab6   :  { %v3042_v20 = vsub.f32 %v1498_v27, %v1514_v12  ;;  %v1991_v27 = vld [vmem:[%s3178_s13 + $0x50] sm:$0xff] }
 0xab7   :  { %1677 = vmatpush.msra.mxu3 %v1991_v27 }
 0xab8   :  { %v1522_v54 = vmul.f32 %v3042_v20, %v3042_v20 }
 0xab9   :  { %1678 = vmatpush.msra.mxu3 %v1990_v6 }
 0xaba   :  { %v1532_v32 = vsel %vm218_vm0, %v1522_v54, 0.0 }
 0xabb   :  { %1533 = vadd.xlane.f32.xlu0 %v1532_v32 }
 0xb16   :  { %v1525_v33 = vpop.xlane.xlu0 %1524 }
 0xb17   :  { %v1535_v11 = vmul.f32 %v1525_v33, %v2764_v42  ;;  %v2066_v33 = vld [vmem:[#allocation11 + $0x1] ss:$0 sm:$0xff] }
 0xb19   :  { %v1539_v25 = vadd.f32 1e-05, %v1535_v11 }
 0xb1b   :  { %2139 = vrsqrt.f32 %v1539_v25  ;;  %vm1549_vm6 = vweird.f32 %v1539_v25 }
 0xb1e   :  { %v1528_v34 = vpop.xlane.xlu2 %1527 }
 0xb1f   :  { %v1536_v26 = vmul.f32 %v1528_v34, %v2764_v42 }
 0xb21   :  { %v2140_v14 = vpop.eup %2139  ;;  %v1540_v28 = vadd.f32 1e-05, %v1536_v26 }
 0xb22   :  { %v1544_v17 = vmul.f32 %v2140_v14, %v1539_v25  ;;  %vm1550_vm1 = vweird.f32 %v2140_v14 }
 0xb23   :  { %2141 = vrsqrt.f32 %v1540_v28  ;;  %vm1551_vm7 = vmor %vm1549_vm6, %vm1550_vm1  ;;  %vm1559_vm9 = vweird.f32 %v1540_v28 }
 0xb24   :  { %v1545_v29 = vmul.f32 %v2140_v14, %v1544_v17 }
 0xb26   :  { %v1546_v30 = vmul.f32 0.5, %v1545_v29  ;;  %v1531_v47 = vpop.xlane.xlu1 %1530 }
 0xb27   :  { %v1537_v56 = vmul.f32 %v1531_v47, %v2764_v42 }
 0xb28   :  { %v1547_v36 = vsub.f32 1.5, %v1546_v30 }
 0xb29   :  { %v2142_v37 = vpop.eup %2141  ;;  %v1541_v38 = vadd.f32 1e-05, %v1537_v56 }
 0xb2a   :  { %v1548_v63 = vmul.f32 %v2140_v14, %v1547_v36  ;;  %v1554_v45 = vmul.f32 %v2142_v37, %v1540_v28  ;;  %vm1560_vm8 = vweird.f32 %v2142_v37  ;;  %v2067_v36 = vld [vmem:[#allocation13 + $0x1] ss:$0 sm:$0xff] }
 0xb2b   :  { %2143 = vrsqrt.f32 %v1541_v38  ;;  %vm1561_vm10 = vmor %vm1559_vm9, %vm1560_vm8  ;;  %vm1569_vm12 = vweird.f32 %v1541_v38 }
 0xb2c   :  { %v1552_v40 = vsel %vm1551_vm7, %v2140_v14, %v1548_v63  ;;  %v1555_v49 = vmul.f32 %v2142_v37, %v1554_v45 }
 0xb2d   :  { %v1583_v43 = vmul.f32 %v1552_v40, %v1515_v8 }
 0xb2e   :  { %v1556_v52 = vmul.f32 0.5, %v1555_v49  ;;  %v1534_v53 = vpop.xlane.xlu0 %1533 }
 0xb2f   :  { %v1590_v39 = vmul.f32 %v3059_v41, %v1583_v43  ;;  %v1538_v44 = vmul.f32 %v1534_v53, %v2764_v42 }
 0xb30   :  { %v1557_v58 = vsub.f32 1.5, %v1556_v52 }
 0xb31   :  { %v2144_v60 = vpop.eup %2143  ;;  %v1542_v61 = vadd.f32 1e-05, %v1538_v44  ;;  %v3075_v59 = vadd.f32 %v2065_v51, %v1590_v39 }
 0xb32   :  { %v1558_v0 = vmul.f32 %v2142_v37, %v1557_v58  ;;  %v1564_v3 = vmul.f32 %v2144_v60, %v1541_v38  ;;  %vm1570_vm11 = vweird.f32 %v2144_v60 }
 0xb33   :  { %2145 = vrsqrt.f32 %v1542_v61  ;;  %2022 = vmatmul.msk.f32.vlgmr.msra.gmra.mxu2 %vm218_vm0, %v3075_v59  ;;  %vm1571_vm13 = vmor %vm1569_vm12, %vm1570_vm11  ;;  %vm1579_vm15 = vweird.f32 %v1542_v61 }
 0xb34   :  { %v1562_v21 = vsel %vm1561_vm10, %v2142_v37, %v1558_v0  ;;  %v1565_v5 = vmul.f32 %v2144_v60, %v1564_v3 }
 0xb35   :  { %v1584_v35 = vmul.f32 %v1562_v21, %v3030_v19 }
 0xb36   :  { %v1566_v8 = vmul.f32 0.5, %v1565_v5 }
 0xb37   :  { %v1591_v55 = vmul.f32 %v3059_v41, %v1584_v35 }
 0xb38   :  { %v1567_v4 = vsub.f32 1.5, %v1566_v8 }
 0xb39   :  { %v2146_v10 = vpop.eup %2145  ;;  %v1598_v2 = vadd.f32 %v2065_v51, %v1591_v55 }
 0xb3a   :  { %v1568_v9 = vmul.f32 %v2144_v60, %v1567_v4  ;;  %v1574_v13 = vmul.f32 %v2146_v10, %v1542_v61  ;;  %vm1580_vm14 = vweird.f32 %v2146_v10 }
 0xb3b   :  { %2023 = vmatmul.msk.f32.gmra.mxu2 %vm218_vm0, %v1598_v2  ;;  %vm1581_vm2 = vmor %vm1579_vm15, %vm1580_vm14  ;;  %vm1830_vm15 = vcmask 1041409  }
 0xb3c   :  { %v1572_v19 = vsel %vm1571_vm13, %v2144_v60, %v1568_v9  ;;  %v1575_v15 = vmul.f32 %v2146_v10, %v1574_v13 }
 0xb3d   :  { %v1585_v16 = vmul.f32 %v1572_v19, %v3036_v57  ;;  %v1989_v57 = vld [vmem:[%s3178_s13 + $0x40] sm:$0xff] }
 0xb3e   :  { %v1576_v7 = vmul.f32 0.5, %v1575_v15  ;;  %1679 = vmatpush.msra.mxu3 %v1989_v57 }
 0xb3f   :  { %v1592_v31 = vmul.f32 %v3059_v41, %v1585_v16 }
 0xb40   :  { %v1577_v18 = vsub.f32 1.5, %v1576_v7 }
 0xb41   :  { %v1599_v12 = vadd.f32 %v2065_v51, %v1592_v31 }
 0xb42   :  { %v1578_v54 = vmul.f32 %v2146_v10, %v1577_v18 }
 0xb43   :  { %2024 = vmatmul.msk.f32.gmra.mxu2 %vm218_vm0, %v1599_v12 }
 0xb44   :  { %v1582_v32 = vsel %vm1581_vm2, %v2146_v10, %v1578_v54  ;;  %vm1833_vm2 = vcmask 254976  }
 0xb45   :  { %v1586_v22 = vmul.f32 %v1582_v32, %v3042_v20 }
 0xb47   :  { %v1593_v23 = vmul.f32 %v3059_v41, %v1586_v22 }
 0xb49   :  { %v1600_v24 = vadd.f32 %v2065_v51, %v1593_v23 }
 0xb4b   :  { %2025 = vmatmul.msk.f32.gmra.mxu2 %vm218_vm0, %v1600_v24 }
 0xbb6   :  { %v1633_v11 = vpop.f32.mrf.mxu2 }
 0xbb7   :  { %v1634_v25 = vadd.f32 %v2066_v33, %v1633_v11 }
 0xbb9   :  { %v1645_v34 = vmax.f32 %v1634_v25, 0.0 }
 0xbbb   :  { %2026 = vmatmul.msk.f32.vlgmr.msra.gmra.mxu3 %vm883_vm3, %v1645_v34 }
 0xbbe   :  { %v1636_v26 = vpop.f32.mrf.mxu2 }
 0xbbf   :  { %v1637_v14 = vadd.f32 %v2066_v33, %v1636_v26 }
 0xbc1   :  { %v1646_v28 = vmax.f32 %v1637_v14, 0.0 }
 0xbc3   :  { %2027 = vmatmul.msk.f32.gmra.mxu3 %vm883_vm3, %v1646_v28 }
 0xbc6   :  { %v1639_v20 = vpop.f32.mrf.mxu2 }
 0xbc7   :  { %v1640_v17 = vadd.f32 %v2066_v33, %v1639_v20 }
 0xbc9   :  { %v1647_v29 = vmax.f32 %v1640_v17, 0.0 }
 0xbcb   :  { %2028 = vmatmul.msk.f32.gmra.mxu3 %vm883_vm3, %v1647_v29 }
 0xbce   :  { %v1642_v30 = vpop.f32.mrf.mxu2 }
 0xbcf   :  { %v1643_v47 = vadd.f32 %v2066_v33, %v1642_v30 }
 0xbd1   :  { %v1648_v56 = vmax.f32 %v1643_v47, 0.0  ;;  %v2068_v47 = vld [vmem:[#allocation14 + $0x1] ss:$0 sm:$0xff] }
 0xbd3   :  { %2029 = vmatmul.msk.f32.gmra.mxu3 %vm883_vm3, %v1648_v56 }
 0xc3e   :  { %v1681_v37 = vpop.f32.mrf.mxu3 }
 0xc3f   :  { %v1682_v38 = vadd.f32 %v2067_v36, %v1681_v37 }
 0xc41   :  { %v1693_v41 = vadd.f32 %v1682_v38, %v3075_v59 }
 0xc43   :  { %v1697_v63 = vsel %vm218_vm0, %v1693_v41, 0.0 }
 0xc44   :  { %1698 = vadd.xlane.f32.xlu2 %v1697_v63 }
 0xc46   :  { %v1684_v45 = vpop.f32.mrf.mxu3 }
 0xc47   :  { %v1685_v46 = vadd.f32 %v2067_v36, %v1684_v45  ;;  %v2069_v45 = vld [vmem:[%s3181_s16 + $0x1] ss:$0 sm:$0xff] }
 0xc49   :  { %v1694_v48 = vadd.f32 %v1685_v46, %v1598_v2 }
 0xc4b   :  { %v1700_v40 = vsel %vm218_vm0, %v1694_v48, 0.0 }
 0xc4c   :  { %1701 = vadd.xlane.f32.xlu1 %v1700_v40 }
 0xc4e   :  { %v1687_v49 = vpop.f32.mrf.mxu3 }
 0xc4f   :  { %v1688_v43 = vadd.f32 %v2067_v36, %v1687_v49 }
 0xc51   :  { %v1695_v51 = vadd.f32 %v1688_v43, %v1599_v12 }
 0xc53   :  { %v1703_v1 = vsel %vm218_vm0, %v1695_v51, 0.0 }
 0xc54   :  { %1704 = vadd.xlane.f32.xlu0 %v1703_v1 }
 0xc56   :  { %v1690_v52 = vpop.f32.mrf.mxu3 }
 0xc57   :  { %v1691_v53 = vadd.f32 %v2067_v36, %v1690_v52 }
 0xc59   :  { %v1696_v39 = vadd.f32 %v1691_v53, %v1600_v24 }
 0xc5b   :  { %v1706_v44 = vsel %vm218_vm0, %v1696_v39, 0.0 }
 0xc5c   :  { %1707 = vadd.xlane.f32.xlu2 %v1706_v44 }
 0xcb7   :  { %v1699_v50 = vpop.xlane.xlu2 %1698 }
 0xcb8   :  { %v1709_v58 = vmul.f32 %v1699_v50, %v2764_v42 }
 0xcba   :  { %v1713_v60 = vsub.f32 %v1693_v41, %v1709_v58 }
 0xcbc   :  { %v1717_v61 = vmul.f32 %v1713_v60, %v1713_v60 }
 0xcbe   :  { %v1721_v59 = vsel %vm218_vm0, %v1717_v61, 0.0 }
 0xcbf   :  { %1722 = vadd.xlane.f32.xlu1 %v1721_v59  ;;  %v1702_v62 = vpop.xlane.xlu1 %1701 }
 0xcc0   :  { %v1710_v0 = vmul.f32 %v1702_v62, %v2764_v42  ;;  %v2427_v62 = vmov 16.0  }
 0xcc2   :  { %v1714_v3 = vsub.f32 %v1694_v48, %v1710_v0 }
 0xcc4   :  { %v1718_v27 = vmul.f32 %v1714_v3, %v1714_v3 }
 0xcc6   :  { %v1724_v21 = vsel %vm218_vm0, %v1718_v27, 0.0 }
 0xcc7   :  { %v1705_v5 = vpop.xlane.xlu0 %1704  ;;  %1725 = vadd.xlane.f32.xlu0 %v1724_v21 }
 0xcc8   :  { %v1711_v35 = vmul.f32 %v1705_v5, %v2764_v42 }
 0xcca   :  { %v3114_v6 = vsub.f32 %v1695_v51, %v1711_v35 }
 0xccc   :  { %v1719_v8 = vmul.f32 %v3114_v6, %v3114_v6 }
 0xcce   :  { %v1727_v55 = vsel %vm218_vm0, %v1719_v8, 0.0 }
 0xccf   :  { %v1708_v4 = vpop.xlane.xlu2 %1707  ;;  %1728 = vadd.xlane.f32.xlu2 %v1727_v55 }
 0xcd0   :  { %v1712_v10 = vmul.f32 %v1708_v4, %v2764_v42 }
 0xcd2   :  { %v3120_v2 = vsub.f32 %v1696_v39, %v1712_v10 }
 0xcd4   :  { %v1720_v9 = vmul.f32 %v3120_v2, %v3120_v2 }
 0xcd6   :  { %v1730_v13 = vsel %vm218_vm0, %v1720_v9, 0.0 }
 0xcd7   :  { %1731 = vadd.xlane.f32.xlu1 %v1730_v13 }
 0xd32   :  { %v1723_v19 = vpop.xlane.xlu1 %1722 }
 0xd33   :  { %v1733_v15 = vmul.f32 %v1723_v19, %v2764_v42 }
 0xd35   :  { %v1737_v16 = vadd.f32 1e-05, %v1733_v15 }
 0xd37   :  { %2147 = vrsqrt.f32 %v1737_v16  ;;  %vm1747_vm4 = vweird.f32 %v1737_v16 }
 0xd3a   :  { %v1726_v7 = vpop.xlane.xlu0 %1725 }
 0xd3b   :  { %v1734_v31 = vmul.f32 %v1726_v7, %v2764_v42 }
 0xd3d   :  { %v2148_v18 = vpop.eup %2147  ;;  %v1738_v12 = vadd.f32 1e-05, %v1734_v31 }
 0xd3e   :  { %v1742_v54 = vmul.f32 %v2148_v18, %v1737_v16  ;;  %vm1748_vm3 = vweird.f32 %v2148_v18 }
 0xd3f   :  { %2149 = vrsqrt.f32 %v1738_v12  ;;  %vm1749_vm5 = vmor %vm1747_vm4, %vm1748_vm3  ;;  %vm1757_vm6 = vweird.f32 %v1738_v12 }
 0xd40   :  { %v1743_v32 = vmul.f32 %v2148_v18, %v1742_v54 }
 0xd42   :  { %v1744_v22 = vmul.f32 0.5, %v1743_v32  ;;  %v1729_v23 = vpop.xlane.xlu2 %1728 }
 0xd43   :  { %v1735_v24 = vmul.f32 %v1729_v23, %v2764_v42 }
 0xd44   :  { %v1745_v57 = vsub.f32 1.5, %v1744_v22 }
 0xd45   :  { %v2150_v33 = vpop.eup %2149  ;;  %v1739_v11 = vadd.f32 1e-05, %v1735_v24 }
 0xd46   :  { %v1746_v25 = vmul.f32 %v2148_v18, %v1745_v57  ;;  %v1752_v34 = vmul.f32 %v2150_v33, %v1738_v12  ;;  %vm1758_vm1 = vweird.f32 %v2150_v33 }
 0xd47   :  { %2151 = vrsqrt.f32 %v1739_v11  ;;  %vm1759_vm7 = vmor %vm1757_vm6, %vm1758_vm1  ;;  %vm1767_vm9 = vweird.f32 %v1739_v11  ;;  %vm1916_vm1 = vcmask 74752  }
 0xd48   :  { %v1753_v26 = vmul.f32 %v2150_v33, %v1752_v34  ;;  %v1750_v14 = vsel %vm1749_vm5, %v2148_v18, %v1746_v25 }
 0xd49   :  { %v1781_v56 = vmul.f32 %v1750_v14, %v1713_v60 }
 0xd4a   :  { %v1754_v28 = vmul.f32 0.5, %v1753_v26  ;;  %v1732_v20 = vpop.xlane.xlu1 %1731 }
 0xd4b   :  { %v1736_v17 = vmul.f32 %v1732_v20, %v2764_v42  ;;  %v1788_v46 = vmul.f32 %v2068_v47, %v1781_v56 }
 0xd4c   :  { %v1755_v29 = vsub.f32 1.5, %v1754_v28 }
 0xd4d   :  { %v2152_v30 = vpop.eup %2151  ;;  %v1740_v36 = vadd.f32 1e-05, %v1736_v17  ;;  %v1795_v1 = vadd.f32 %v2069_v45, %v1788_v46  ;;  %v1883_v46 = vld [vmem:[%s3184_s19 + $0x8] sm:$0xff] }
 0xd4e   :  { %v1756_v37 = vmul.f32 %v2150_v33, %v1755_v29  ;;  %v1762_v38 = vmul.f32 %v2152_v30, %v1739_v11  ;;  %vm1768_vm8 = vweird.f32 %v2152_v30 }
 0xd4f   :  { %2153 = vrsqrt.f32 %v1740_v36  ;;  %vm1769_vm10 = vmor %vm1767_vm9, %vm1768_vm8  ;;  %v1799_v60 = vsel %vm218_vm0, %v1795_v1, 0.0  ;;  %vm1777_vm12 = vweird.f32 %v1740_v36 }
 0xd50   :  { %v1760_v41 = vsel %vm1759_vm7, %v2150_v33, %v1756_v37  ;;  %v1763_v63 = vmul.f32 %v2152_v30, %v1762_v38  ;;  %2155 = vrcp.f32 %v2427_v62 }
 0xd51   :  { %v1782_v48 = vmul.f32 %v1760_v41, %v1714_v3 }
 0xd52   :  { %v1764_v40 = vmul.f32 0.5, %v1763_v63  ;;  %v1885_v63 = vld [vmem:[%s3184_s19 + $0x18] sm:$0xff] }
 0xd53   :  { %v1789_v49 = vmul.f32 %v2068_v47, %v1782_v48  ;;  %1908 = vmatpush.msra.mxu0 %v1885_v63  ;;  %v1882_v48 = vld [vmem:[%s3184_s19] sm:$0xff] }
 0xd54   :  { %v1765_v43 = vsub.f32 1.5, %v1764_v40 }
 0xd55   :  { %v2154_v51 = vpop.eup %2153  ;;  %v1796_v52 = vadd.f32 %v2069_v45, %v1789_v49 }
 0xd56   :  { %v1766_v53 = vmul.f32 %v2152_v30, %v1765_v43  ;;  %v1772_v39 = vmul.f32 %v2154_v51, %v1740_v36  ;;  %vm1778_vm11 = vweird.f32 %v2154_v51  ;;  %v2156_v35 = vpop.eup %2155 }
 0xd57   :  { %v1800_v44 = vsel %vm218_vm0, %v1796_v52, 0.0  ;;  %vm1779_vm13 = vmor %vm1777_vm12, %vm1778_vm11  ;;  %v1818_v13 = vmul.f32 16.0, %v2156_v35  ;;  %vm1822_vm14 = vweird.f32 %v2156_v35 }
 0xd58   :  { %v1770_v50 = vsel %vm1769_vm10, %v2152_v30, %v1766_v53  ;;  %v1773_v58 = vmul.f32 %v2154_v51, %v1772_v39  ;;  %v1801_v59 = vadd.f32 %v1800_v44, %v1799_v60 }
 0xd59   :  { %v1783_v0 = vmul.f32 %v1770_v50, %v3114_v6  ;;  %v1819_v7 = vsub.f32 1.0, %v1818_v13 }
 0xd5a   :  { %v1774_v61 = vmul.f32 0.5, %v1773_v58  ;;  %v1802_v21 = vrot.slane %v1801_v59, 4  ;;  %v2070_v58 = vld [vmem:[%s3182_s17] ss:$0 sm:$0xff] }
 0xd5b   :  { %v1790_v5 = vmul.f32 %v2068_v47, %v1783_v0  ;;  %v1820_v54 = vmul.f32 %v2156_v35, %v1819_v7  ;;  %v2071_v0 = vld [vmem:[#allocation16] ss:$0 sm:$0xff] }
 0xd5c   :  { %v1775_v3 = vsub.f32 1.5, %v1774_v61  ;;  %v1803_v4 = vadd.f32 %v1802_v21, %v1801_v59 }
 0xd5d   :  { %v1797_v10 = vadd.f32 %v2069_v45, %v1790_v5  ;;  %v1821_v24 = vadd.f32 %v2156_v35, %v1820_v54 }
 0xd5e   :  { %v1776_v27 = vmul.f32 %v2154_v51, %v1775_v3  ;;  %v1804_v15 = vrot.slane %v1803_v4, 2 }
 0xd5f   :  { %v1808_v16 = vsel %vm218_vm0, %v1797_v10, 0.0  ;;  %v1823_v11 = vsel %vm1822_vm14, %v2156_v35, %v1821_v24  ;;  %v2072_v35 = vld [vmem:[%s3185_s20] ss:$0 sm:$0xff] }
 0xd60   :  { %v1780_v8 = vsel %vm1779_vm13, %v2154_v51, %v1776_v27  ;;  %v1805_v18 = vadd.f32 %v1804_v15, %v1803_v4 }
 0xd61   :  { %v1784_v55 = vmul.f32 %v1780_v8, %v3120_v2 }
 0xd62   :  { %v1806_v22 = vrot.slane %v1805_v18, 1 }
 0xd63   :  { %v1791_v9 = vmul.f32 %v2068_v47, %v1784_v55 }
 0xd64   :  { %v1807_v57 = vadd.f32 %v1806_v22, %v1805_v18 }
 0xd65   :  { %v1798_v19 = vadd.f32 %v2069_v45, %v1791_v9  ;;  %v1884_v45 = vld [vmem:[%s3184_s19 + $0x10] sm:$0xff] }
 0xd66   :  { %v1824_v34 = vmul.f32 %v1823_v11, %v1807_v57  ;;  %1909 = vmatpush.msra.mxu0 %v1884_v45 }
 0xd67   :  { %v1809_v6 = vsel %vm218_vm0, %v1798_v19, 0.0 }
 0xd68   :  { %v1810_v31 = vadd.f32 %v1809_v6, %v1808_v16  ;;  %1910 = vmatpush.msra.mxu0 %v1883_v46 }
 0xd6a   :  { %v1811_v12 = vrot.slane %v1810_v31, 4  ;;  %1911 = vmatpush.msra.mxu0 %v1882_v48 }
 0xd6c   :  { %v1812_v32 = vadd.f32 %v1811_v12, %v1810_v31 }
 0xd6e   :  { %v1813_v23 = vrot.slane %v1812_v32, 2 }
 0xd70   :  { %v1814_v2 = vadd.f32 %v1813_v23, %v1812_v32 }
 0xd72   :  { %v1815_v33 = vrot.slane %v1814_v2, 1 }
 0xd74   :  { %v1816_v25 = vadd.f32 %v1815_v33, %v1814_v2 }
 0xd76   :  { %v1825_v26 = vmul.f32 %v1823_v11, %v1816_v25 }
 0xd78   :  { %v1831_v14 = vsel %vm1830_vm15, %v1825_v26, %v1824_v34 }
 0xd79   :  { %v1834_v28 = vsel %vm1833_vm2, %v1831_v14, 0.0 }
 0xd7a   :  { %1835 = vadd.xlane.f32.xlu0 %v1834_v28 }
 0xded   :  { %v1836_v20 = vpop.xlane.xlu0 %1835 }
 0xdee   :  { %v1837_v17 = vmul.f32 %v1836_v20, %v2764_v42 }
 0xdf0   :  { %v1839_v29 = vrot.slane %v1837_v17, 1  ;;  %v1842_v30 = vsub.f32 %v1824_v34, %v1837_v17 }
 0xdf2   :  { %v1843_v47 = vsub.f32 %v1825_v26, %v1839_v29  ;;  %v1844_v36 = vmul.f32 %v1842_v30, %v1842_v30 }
 0xdf4   :  { %v1845_v56 = vmul.f32 %v1843_v47, %v1843_v47 }
 0xdf6   :  { %v1848_v37 = vrot.slane %v1845_v56, 7 }
 0xdf8   :  { %v1849_v38 = vsel %vm1830_vm15, %v1848_v37, %v1844_v36 }
 0xdf9   :  { %v1851_v41 = vsel %vm1833_vm2, %v1849_v38, 0.0 }
 0xdfa   :  { %1852 = vadd.xlane.f32.xlu2 %v1851_v41 }
 0xe6d   :  { %v1853_v40 = vpop.xlane.xlu2 %1852 }
 0xe6e   :  { %v1854_v49 = vmul.f32 %v1853_v40, %v2764_v42 }
 0xe70   :  { %v1855_v43 = vadd.f32 1e-05, %v1854_v49 }
 0xe72   :  { %2157 = vrsqrt.f32 %v1855_v43  ;;  %vm1862_vm4 = vweird.f32 %v1855_v43 }
 0xe78   :  { %v2158_v51 = vpop.eup %2157 }
 0xe79   :  { %v1857_v1 = vmul.f32 %v2158_v51, %v1855_v43  ;;  %vm1863_vm3 = vweird.f32 %v2158_v51 }
 0xe7a   :  { %vm1864_vm5 = vmor %vm1862_vm4, %vm1863_vm3 }
 0xe7b   :  { %v1858_v52 = vmul.f32 %v2158_v51, %v1857_v1 }
 0xe7d   :  { %v1859_v53 = vmul.f32 0.5, %v1858_v52 }
 0xe7f   :  { %v1860_v39 = vsub.f32 1.5, %v1859_v53 }
 0xe81   :  { %v1861_v44 = vmul.f32 %v2158_v51, %v1860_v39 }
 0xe83   :  { %v1865_v50 = vsel %vm1864_vm5, %v2158_v51, %v1861_v44 }
 0xe84   :  { %v1867_v60 = vrot.slane %v1865_v50, 1  ;;  %v1870_v61 = vmul.f32 %v1865_v50, %v1842_v30 }
 0xe86   :  { %v1871_v59 = vmul.f32 %v1867_v60, %v1843_v47  ;;  %v1875_v42 = vmul.f32 %v2070_v58, %v1870_v61 }
 0xe88   :  { %v1876_v62 = vmul.f32 %v2070_v58, %v1871_v59  ;;  %v1880_v27 = vadd.f32 %v2071_v0, %v1875_v42 }
 0xe8a   :  { %v1881_v3 = vadd.f32 %v2071_v0, %v1876_v62 }
 0xe8c   :  { %v1892_v21 = vrot.slane %v1881_v3, 7 }
 0xe8e   :  { %v1893_v5 = vsel %vm1830_vm15, %v1892_v21, %v1880_v27 }
 0xe8f   :  { %2030 = vmatmul.msk.f32.vlgmr.msra.gmra.mxu0 %vm218_vm0, %v1893_v5 }
 0xf0c   :  { %v1913_v8 = vpop.f32.mrf.mxu0 }
 0xf0d   :  { %v1914_v55 = vadd.f32 %v2072_v35, %v1913_v8 }
 0xf0f   :  { %1917 = vst.msk [vmem:[#allocation17] sm:$0x3] %vm1916_vm1, %v1914_v55 }
 0xf10   :  { %1928 = dma.vmem_to_hbm [thread:$0]  %s1924_s24, 32, %s1926_s5, [#allocation4]  }
 0xf11   :  { %2409 = dma.done.wait [#allocation4], 32  }
 0xf12   :  { %2410 = vsyncadd [#allocation4], 4294967264 }
 0xf13   :  { %1933 = vsyncpa [#allocation3], 1 }
 0xf14   :  { %1934 = vsyncpa [#allocation6], 1 }
 0xf15   :  { %1935 = vsyncpa [#allocation9], 1 }
 0xf16   :  { %1936 = vsyncpa [#allocation12], 1 }
 0xf17   :  { %1937 = vsyncpa [#allocation15], 1 }
 0xf18   :  { %1938 = vsyncpa [#allocation4], 1 }

</bundles_post_ra>
